<compile_context>
chip_gen: v6e
topology: v6e:2x2x1
jax: 0.10.0
libtpu: 0.0.40
codegen_flags: <defaults>
</compile_context>

<pallas_src>
import functools

import jax
import jax.numpy as jnp
from jax import lax
from jax.experimental import pallas as pl
from jax.experimental.pallas import tpu as pltpu


_BATCH_BLOCK = 8  # sublane-aligned batch tile processed per grid step


def _round_up(x, m):
    return (x + m - 1) // m * m


def gru_seq_encoder_kernel(x_ref, lens_ref, w_ih_ref, w_hh_ref, b_i_ref, b_hn_ref,
                           mem_ref, sum_ref, gi_ref):
    """Single-layer GRU over one padded batch block, fully in VMEM.

    x_ref   : (S, Bb, Ep)  f32   time-major embedded tokens
    lens_ref: (Bb, 1)      i32   valid lengths per batch element
    w_ih_ref: (Ep, 3*Hp)   f32   fused input->hidden weights  [r | z | n]
    w_hh_ref: (Hp, 3*Hp)   f32   fused hidden->hidden weights [r | z | n]
    b_i_ref : (1, 3*Hp)    f32   folded biases [b_ir+b_hr | b_iz+b_hz | b_in]
    b_hn_ref: (1, Hp)      f32   n-gate hidden bias (gated by r, can't be folded)
    mem_ref : (S, Bb, Hp)  f32   per-step hidden states (zero at padded steps)
    sum_ref : (Bb, Hp)     f32   hidden state at last valid token
    gi_ref  : (S, Bb, 3*Hp)f32   VMEM scratch holding precomputed input projections
    """
    S, Bb, E = x_ref.shape
    H = sum_ref.shape[-1]

    # --- Bulk input projection for all time steps: one large lane-dense matmul.
    # Removes 3 of the 6 per-step matmuls from the serial dependency chain.
    x_all = x_ref[...].reshape(S * Bb, E)
    gi_ref[...] = (
        jnp.dot(x_all, w_ih_ref[...], preferred_element_type=jnp.float32)
        + b_i_ref[...]
    ).reshape(S, Bb, 3 * H)

    lens = lens_ref[...]                                   # (Bb, 1) int32
    w_hh = w_hh_ref[...]                                   # (Hp, 3*Hp)
    b_hn = jnp.broadcast_to(b_hn_ref[...], (Bb, H))        # hoisted broadcast

    def step(t, h):
        gi = gi_ref[t]                                     # (Bb, 3H) precomputed
        # Single fused hidden-side matmul per step (1 MXU push instead of 3).
        gh = jnp.dot(h, w_hh, preferred_element_type=jnp.float32)   # (Bb, 3H)

        r = jax.nn.sigmoid(gi[:, 0:H] + gh[:, 0:H])
        z = jax.nn.sigmoid(gi[:, H:2 * H] + gh[:, H:2 * H])
        n = jnp.tanh(gi[:, 2 * H:] + r * (gh[:, 2 * H:] + b_hn))
        h_new = (1.0 - z) * n + z * h                      # standard GRU update

        valid = t < lens                                   # (Bb, 1), broadcasts over H
        mem_ref[t] = jnp.where(valid, h_new, 0.0)          # zero memory at padded steps
        return jnp.where(valid, h_new, h)                  # freeze state past the pad

    h_final = lax.fori_loop(0, S, step, jnp.zeros((Bb, H), jnp.float32),
                            unroll=True)
    sum_ref[...] = h_final


def make_params(key, vocab_size, embed_dim, hidden_dim):
    """Deterministic synthetic parameters (embedding + GRU weights).

    NOTE: weight layout (3, in_dim, H) is the transpose of PyTorch's
    weight_ih_l0 / weight_hh_l0 (3H, in_dim); a real checkpoint must be
    transposed before prepare_params."""
    ks = jax.random.split(key, 5)
    scale = 0.1
    return {
        "embedding": scale * jax.random.normal(ks[0], (vocab_size, embed_dim), jnp.float32),
        "w_ih": scale * jax.random.normal(ks[1], (3, embed_dim, hidden_dim), jnp.float32),
        "w_hh": scale * jax.random.normal(ks[2], (3, hidden_dim, hidden_dim), jnp.float32),
        "b_ih": scale * jax.random.normal(ks[3], (3, 1, hidden_dim), jnp.float32),
        "b_hh": scale * jax.random.normal(ks[4], (3, 1, hidden_dim), jnp.float32),
    }


def prepare_params(raw):
    """Fuse the 3 GRU gate weights into lane-dense (in, 3H) matrices and
    zero-pad embed/hidden dims up to multiples of 128 lanes (one-time cost)."""
    E = raw["w_ih"].shape[1]
    H = raw["w_hh"].shape[1]
    Ep = _round_up(E, 128)
    Hp = _round_up(H, 128)

    def fuse_pad_w(w, in_dim, in_dim_p):
        out = jnp.zeros((in_dim_p, 3 * Hp), jnp.float32)
        for g in range(3):
            out = out.at[:in_dim, g * Hp:g * Hp + H].set(w[g])
        return out

    def fuse_pad_b(vecs):  # list of 3 arrays shaped (1, H)
        out = jnp.zeros((1, 3 * Hp), jnp.float32)
        for g in range(3):
            out = out.at[:, g * Hp:g * Hp + H].set(vecs[g])
        return out

    emb = raw["embedding"]
    emb_p = jnp.zeros((emb.shape[0], Ep), jnp.float32).at[:, :E].set(emb)

    b_ih, b_hh = raw["b_ih"], raw["b_hh"]
    return {
        "embedding": emb_p,                                  # (V, Ep)
        "w_ih": fuse_pad_w(raw["w_ih"], E, Ep),              # (Ep, 3Hp)
        "w_hh": fuse_pad_w(raw["w_hh"], H, Hp),              # (Hp, 3Hp)
        # r/z biases are ungated so input+hidden biases fold together;
        # the n-gate hidden bias stays separate (it is multiplied by r).
        "b_i": fuse_pad_b([b_ih[0] + b_hh[0], b_ih[1] + b_hh[1], b_ih[2]]),  # (1, 3Hp)
        "b_hn": jnp.zeros((1, Hp), jnp.float32).at[:, :H].set(b_hh[2]),      # (1, Hp)
    }


@functools.partial(jax.jit, static_argnames=("hidden_dim",))
def string_query_encoder_forward(token_ids, input_lens, prep, *, hidden_dim):
    """StringQueryEncoder.forward on pre-tokenized queries.

    token_ids : (B, S) int32 padded vocab indices
    input_lens: (B,)   int32 valid lengths
    Returns (summary (B,H), memory (B,S,H), token_ids), mirroring
    (summary, memory, tokenized) of the PyTorch module.
    """
    B, S = token_ids.shape
    Bb = _BATCH_BLOCK
    Bp = _round_up(max(B, Bb), Bb)

    emb = prep["embedding"]                 # (V, Ep) lane-padded
    Ep = emb.shape[1]
    Hp = prep["w_hh"].shape[0]

    # Pad batch to a sublane multiple; padded rows get length 0 -> contribute 0.
    ids_p = jnp.zeros((Bp, S), jnp.int32).at[:B].set(token_ids.astype(jnp.int32))
    lens_p = jnp.zeros((Bp, 1), jnp.int32).at[:B, 0].set(input_lens.astype(jnp.int32))

    # query_vectorizer: embedding gather, emitted directly time-major so the
    # activation tensor never takes an extra transpose pass through HBM.
    x_t = jnp.take(emb, ids_p.T, axis=0)    # (S, Bp, Ep)

    grid = (Bp // Bb,)

    # Explicit VMEM budget (per-block working set, double-buffered I/O) so the
    # kernel also fits v5e's 16 MiB default scoped limit at larger shapes.
    f32 = 4
    block_bytes = (
        2 * S * Bb * Ep * f32              # x block (double-buffered)
        + 2 * S * Bb * Hp * f32            # memory block
        + 2 * Bb * Hp * f32                # summary block
        + S * Bb * 3 * Hp * f32            # gi scratch
        + 2 * (Ep + Hp) * 3 * Hp * f32     # fused weights
        + 2 * (3 * Hp + Hp) * f32          # biases
        + 2 * Bb * 4                       # lens
    )
    vmem_limit = int(min(96 * 2**20, max(block_bytes + (4 << 20), 32 << 20)))

    mem_t, summary = pl.pallas_call(
        gru_seq_encoder_kernel,
        out_shape=(
            jax.ShapeDtypeStruct((S, Bp, Hp), jnp.float32),
            jax.ShapeDtypeStruct((Bp, Hp), jnp.float32),
        ),
        grid_spec=pltpu.PrefetchScalarGridSpec(
            num_scalar_prefetch=0,
            grid=grid,
            in_specs=[
                pl.BlockSpec((S, Bb, Ep), lambda b: (0, b, 0)),      # x (time-major)
                pl.BlockSpec((Bb, 1), lambda b: (b, 0)),             # lens
                pl.BlockSpec((Ep, 3 * Hp), lambda b: (0, 0)),        # w_ih (resident)
                pl.BlockSpec((Hp, 3 * Hp), lambda b: (0, 0)),        # w_hh (resident)
                pl.BlockSpec((1, 3 * Hp), lambda b: (0, 0)),         # folded biases
                pl.BlockSpec((1, Hp), lambda b: (0, 0)),             # b_hn
            ],
            out_specs=(
                pl.BlockSpec((S, Bb, Hp), lambda b: (0, b, 0)),      # memory
                pl.BlockSpec((Bb, Hp), lambda b: (b, 0)),            # summary
            ),
            scratch_shapes=[pltpu.VMEM((S, Bb, 3 * Hp), jnp.float32)],
        ),
        compiler_params=pltpu.CompilerParams(
            dimension_semantics=("parallel",),   # batch blocks -> megacore on v7x
            vmem_limit_bytes=vmem_limit,
        ),
    )(x_t, lens_p, prep["w_ih"], prep["w_hh"], prep["b_i"], prep["b_hn"])

    summary = summary[:B, :hidden_dim]
    # TODO(synk): the batch-major transpose of `memory` is left to XLA here; a
    # fully fused variant would write the (B, S, H) layout from the kernel.
    memory = jnp.transpose(mem_t[:, :B, :hidden_dim], (1, 0, 2))
    return summary, memory, token_ids


def reference_forward(token_ids, input_lens, params):
    """Pure-JAX reference of the same semantics (for correctness check)."""
    emb = params["embedding"]
    x = jnp.take(emb, token_ids, axis=0)             # (B, S, E)
    B, S, _ = x.shape
    H = params["w_hh"].shape[-1]
    w_ih, w_hh, b_ih, b_hh = (params["w_ih"], params["w_hh"],
                              params["b_ih"], params["b_hh"])
    lens = input_lens.astype(jnp.int32).reshape(B, 1)

    def step(h, inputs):
        x_t, t = inputs
        gi = [x_t @ w_ih[g] + b_ih[g] for g in range(3)]
        gh = [h @ w_hh[g] + b_hh[g] for g in range(3)]
        r = jax.nn.sigmoid(gi[0] + gh[0])
        z = jax.nn.sigmoid(gi[1] + gh[1])
        n = jnp.tanh(gi[2] + r * gh[2])
        h_new = (1.0 - z) * n + z * h
        valid = t < lens
        h_out = jnp.where(valid, h_new, h)
        return h_out, jnp.where(valid, h_new, 0.0)

    h0 = jnp.zeros((B, H), jnp.float32)
    xs = (jnp.transpose(x, (1, 0, 2)), jnp.arange(S, dtype=jnp.int32))
    h_final, mem_t = lax.scan(step, h0, xs)
    return h_final, jnp.transpose(mem_t, (1, 0, 2))


if __name__ == "__main__":
    B, S = 2, 8          # batch of 2 "queries", padded to 8 tokens
    VOCAB, E, H = 50, 32, 32

    key = jax.random.PRNGKey(0)
    k_tok, k_param = jax.random.split(key)
    raw_params = make_params(k_param, VOCAB, E, H)
    prep_params = prepare_params(raw_params)   # fuse + tile-pad once, outside jit

    token_ids = jax.random.randint(k_tok, (B, S), 0, VOCAB, dtype=jnp.int32)
    input_lens = jnp.array([8, 5], dtype=jnp.int32)   # second query is padded

    summary, memory, tokenized = string_query_encoder_forward(
        token_ids, input_lens, prep_params, hidden_dim=H)
    jax.block_until_ready((summary, memory))

    ref_summary, ref_memory = reference_forward(token_ids, input_lens, raw_params)
    assert summary.shape == (B, H) and memory.shape == (B, S, H)
    assert jnp.allclose(summary, ref_summary, atol=1e-5, rtol=1e-5)
    assert jnp.allclose(memory, ref_memory, atol=1e-5, rtol=1e-5)

    print("KERNEL_OK")
</pallas_src>

<mosaic_0001>
module attributes {stable_mosaic.version = 11 : i64} {
  func.func @gru_seq_encoder_kernel(%arg0: i32, %arg1: memref<8x8x128xf32, #tpu.memory_space<vmem>>, %arg2: memref<8x1xi32, #tpu.memory_space<vmem>>, %arg3: memref<128x384xf32, #tpu.memory_space<vmem>>, %arg4: memref<128x384xf32, #tpu.memory_space<vmem>>, %arg5: memref<1x384xf32, #tpu.memory_space<vmem>>, %arg6: memref<1x128xf32, #tpu.memory_space<vmem>>, %arg7: memref<8x8x128xf32, #tpu.memory_space<vmem>>, %arg8: memref<8x128xf32, #tpu.memory_space<vmem>>, %arg9: memref<8x8x384xf32, #tpu.memory_space<vmem>>) attributes {dimension_semantics = [#tpu.dimension_semantics<parallel>], iteration_bounds = array<i64: 1>, scalar_prefetch = 0 : i64, scratch_operands = 1 : i64, tpu.core_type = #tpu.core_type<tc>, window_params = [{transform_indices = @transform_0, window_bounds = array<i64: 8, 8, 128>}, {transform_indices = @transform_1, window_bounds = array<i64: 8, 1>}, {pipeline_mode = #tpu.pipeline_mode<synchronous>, transform_indices = @transform_2, window_bounds = array<i64: 128, 384>}, {pipeline_mode = #tpu.pipeline_mode<synchronous>, transform_indices = @transform_3, window_bounds = array<i64: 128, 384>}, {pipeline_mode = #tpu.pipeline_mode<synchronous>, transform_indices = @transform_4, window_bounds = array<i64: 1, 384>}, {pipeline_mode = #tpu.pipeline_mode<synchronous>, transform_indices = @transform_5, window_bounds = array<i64: 1, 128>}, {transform_indices = @transform_6, window_bounds = array<i64: 8, 8, 128>}, {transform_indices = @transform_7, window_bounds = array<i64: 8, 128>}]} {
    %c0 = arith.constant 0 : index
    %c0_0 = arith.constant 0 : index
    %c0_1 = arith.constant 0 : index
    %0 = vector.load %arg1[%c0, %c0_0, %c0_1] : memref<8x8x128xf32, #tpu.memory_space<vmem>>, vector<8x8x128xf32>
    %1 = vector.shape_cast %0 : vector<8x8x128xf32> to vector<64x128xf32>
    %c0_2 = arith.constant 0 : index
    %c0_3 = arith.constant 0 : index
    %2 = vector.load %arg3[%c0_2, %c0_3] : memref<128x384xf32, #tpu.memory_space<vmem>>, vector<128x384xf32>
    %cst = arith.constant dense<0.000000e+00> : vector<64x384xf32>
    %3 = tpu.matmul %1, %2, %cst {dimension_numbers = #tpu.dot_dimension_numbers<[1], [0], [0], [1], [0, 0, 1, 1], [], []>} : vector<64x128xf32>, vector<128x384xf32>, vector<64x384xf32> -> vector<64x384xf32>
    %c0_4 = arith.constant 0 : index
    %c0_5 = arith.constant 0 : index
    %4 = vector.load %arg5[%c0_4, %c0_5] : memref<1x384xf32, #tpu.memory_space<vmem>>, vector<1x384xf32>
    %5 = vector.broadcast %4 : vector<1x384xf32> to vector<64x384xf32>
    %6 = arith.addf %3, %5 : vector<64x384xf32>
    %7 = vector.shape_cast %6 : vector<64x384xf32> to vector<8x8x384xf32>
    %c0_6 = arith.constant 0 : index
    %c0_7 = arith.constant 0 : index
    %c0_8 = arith.constant 0 : index
    %8 = vector.load %arg9[%c0_6, %c0_7, %c0_8] : memref<8x8x384xf32, #tpu.memory_space<vmem>>, vector<8x8x384xf32>
    tpu.vector_store %arg9[%c0_6, %c0_7, %c0_8], %7 {strides = array<i32>} : memref<8x8x384xf32, #tpu.memory_space<vmem>>, vector<8x8x384xf32>,
    %c0_9 = arith.constant 0 : index
    %c0_10 = arith.constant 0 : index
    %9 = vector.load %arg2[%c0_9, %c0_10] : memref<8x1xi32, #tpu.memory_space<vmem>>, vector<8x1xi32>
    %c0_11 = arith.constant 0 : index
    %c0_12 = arith.constant 0 : index
    %10 = vector.load %arg4[%c0_11, %c0_12] : memref<128x384xf32, #tpu.memory_space<vmem>>, vector<128x384xf32>
    %c0_13 = arith.constant 0 : index
    %c0_14 = arith.constant 0 : index
    %11 = vector.load %arg6[%c0_13, %c0_14] : memref<1x128xf32, #tpu.memory_space<vmem>>, vector<1x128xf32>
    %12 = vector.shape_cast %11 : vector<1x128xf32> to vector<1x128xf32>
    %13 = vector.broadcast %12 : vector<1x128xf32> to vector<8x128xf32>
    %cst_15 = arith.constant 0.000000e+00 : f32
    %14 = vector.broadcast %cst_15 : f32 to vector<8x128xf32>
    %c0_i32 = arith.constant 0 : i32
    %15 = arith.index_cast %c0_i32 : i32 to index
    %c0_16 = arith.constant 0 : index
    %c0_17 = arith.constant 0 : index
    %16 = vector.load %arg9[%15, %c0_16, %c0_17] : memref<8x8x384xf32, #tpu.memory_space<vmem>>, vector<1x8x384xf32>
    %17 = vector.shape_cast %16 : vector<1x8x384xf32> to vector<8x384xf32>
    %cst_18 = arith.constant dense<0.000000e+00> : vector<8x384xf32>
    %18 = tpu.matmul %14, %10, %cst_18 {dimension_numbers = #tpu.dot_dimension_numbers<[1], [0], [0], [1], [0, 0, 1, 1], [], []>} : vector<8x128xf32>, vector<128x384xf32>, vector<8x384xf32> -> vector<8x384xf32>
    %19 = vector.extract_strided_slice %17 {offsets = [0, 0], sizes = [8, 128], strides = [1, 1]} : vector<8x384xf32> to vector<8x128xf32>
    %20 = vector.extract_strided_slice %18 {offsets = [0, 0], sizes = [8, 128], strides = [1, 1]} : vector<8x384xf32> to vector<8x128xf32>
    %21 = arith.addf %19, %20 : vector<8x128xf32>
    %22 = arith.negf %21 : vector<8x128xf32>
    %23 = math.exp %22 : vector<8x128xf32>
    %cst_19 = arith.constant 1.000000e+00 : f32
    %24 = vector.broadcast %cst_19 : f32 to vector<8x128xf32>
    %25 = arith.addf %24, %23 : vector<8x128xf32>
    %26 = arith.divf %24, %25 : vector<8x128xf32>
    %27 = vector.extract_strided_slice %17 {offsets = [0, 128], sizes = [8, 128], strides = [1, 1]} : vector<8x384xf32> to vector<8x128xf32>
    %28 = vector.extract_strided_slice %18 {offsets = [0, 128], sizes = [8, 128], strides = [1, 1]} : vector<8x384xf32> to vector<8x128xf32>
    %29 = arith.addf %27, %28 : vector<8x128xf32>
    %30 = arith.negf %29 : vector<8x128xf32>
    %31 = math.exp %30 : vector<8x128xf32>
    %cst_20 = arith.constant 1.000000e+00 : f32
    %32 = vector.broadcast %cst_20 : f32 to vector<8x128xf32>
    %33 = arith.addf %32, %31 : vector<8x128xf32>
    %34 = arith.divf %32, %33 : vector<8x128xf32>
    %35 = vector.extract_strided_slice %17 {offsets = [0, 256], sizes = [8, 128], strides = [1, 1]} : vector<8x384xf32> to vector<8x128xf32>
    %36 = vector.extract_strided_slice %18 {offsets = [0, 256], sizes = [8, 128], strides = [1, 1]} : vector<8x384xf32> to vector<8x128xf32>
    %37 = arith.addf %36, %13 : vector<8x128xf32>
    %38 = arith.mulf %26, %37 : vector<8x128xf32>
    %39 = arith.addf %35, %38 : vector<8x128xf32>
    %40 = math.tanh %39 : vector<8x128xf32>
    %cst_21 = arith.constant 1.000000e+00 : f32
    %41 = vector.broadcast %cst_21 : f32 to vector<8x128xf32>
    %42 = arith.subf %41, %34 : vector<8x128xf32>
    %43 = arith.mulf %42, %40 : vector<8x128xf32>
    %44 = arith.mulf %34, %14 : vector<8x128xf32>
    %45 = arith.addf %43, %44 : vector<8x128xf32>
    %46 = vector.broadcast %c0_i32 : i32 to vector<8x1xi32>
    %47 = arith.cmpi slt, %46, %9 : vector<8x1xi32>
    %cst_22 = arith.constant 0.000000e+00 : f32
    %48 = vector.shape_cast %47 : vector<8x1xi1> to vector<8x1xi1>
    %49 = vector.broadcast %48 : vector<8x1xi1> to vector<8x128xi1>
    %50 = vector.broadcast %cst_22 : f32 to vector<8x128xf32>
    %51 = arith.select %49, %45, %50 : vector<8x128xi1>, vector<8x128xf32>
    %52 = arith.index_cast %c0_i32 : i32 to index
    %c0_23 = arith.constant 0 : index
    %c0_24 = arith.constant 0 : index
    %53 = vector.load %arg7[%52, %c0_23, %c0_24] : memref<8x8x128xf32, #tpu.memory_space<vmem>>, vector<1x8x128xf32>
    %54 = vector.shape_cast %53 : vector<1x8x128xf32> to vector<8x128xf32>
    %55 = vector.shape_cast %51 : vector<8x128xf32> to vector<1x8x128xf32>
    tpu.vector_store %arg7[%52, %c0_23, %c0_24], %55 {strides = array<i32>} : memref<8x8x128xf32, #tpu.memory_space<vmem>>, vector<1x8x128xf32>,
    %56 = vector.shape_cast %47 : vector<8x1xi1> to vector<8x1xi1>
    %57 = vector.broadcast %56 : vector<8x1xi1> to vector<8x128xi1>
    %58 = arith.select %57, %45, %14 : vector<8x128xi1>, vector<8x128xf32>
    %c1_i32 = arith.constant 1 : i32
    %59 = arith.index_cast %c1_i32 : i32 to index
    %c0_25 = arith.constant 0 : index
    %c0_26 = arith.constant 0 : index
    %60 = vector.load %arg9[%59, %c0_25, %c0_26] : memref<8x8x384xf32, #tpu.memory_space<vmem>>, vector<1x8x384xf32>
    %61 = vector.shape_cast %60 : vector<1x8x384xf32> to vector<8x384xf32>
    %cst_27 = arith.constant dense<0.000000e+00> : vector<8x384xf32>
    %62 = tpu.matmul %58, %10, %cst_27 {dimension_numbers = #tpu.dot_dimension_numbers<[1], [0], [0], [1], [0, 0, 1, 1], [], []>} : vector<8x128xf32>, vector<128x384xf32>, vector<8x384xf32> -> vector<8x384xf32>
    %63 = vector.extract_strided_slice %61 {offsets = [0, 0], sizes = [8, 128], strides = [1, 1]} : vector<8x384xf32> to vector<8x128xf32>
    %64 = vector.extract_strided_slice %62 {offsets = [0, 0], sizes = [8, 128], strides = [1, 1]} : vector<8x384xf32> to vector<8x128xf32>
    %65 = arith.addf %63, %64 : vector<8x128xf32>
    %66 = arith.negf %65 : vector<8x128xf32>
    %67 = math.exp %66 : vector<8x128xf32>
    %cst_28 = arith.constant 1.000000e+00 : f32
    %68 = vector.broadcast %cst_28 : f32 to vector<8x128xf32>
    %69 = arith.addf %68, %67 : vector<8x128xf32>
    %70 = arith.divf %68, %69 : vector<8x128xf32>
    %71 = vector.extract_strided_slice %61 {offsets = [0, 128], sizes = [8, 128], strides = [1, 1]} : vector<8x384xf32> to vector<8x128xf32>
    %72 = vector.extract_strided_slice %62 {offsets = [0, 128], sizes = [8, 128], strides = [1, 1]} : vector<8x384xf32> to vector<8x128xf32>
    %73 = arith.addf %71, %72 : vector<8x128xf32>
    %74 = arith.negf %73 : vector<8x128xf32>
    %75 = math.exp %74 : vector<8x128xf32>
    %cst_29 = arith.constant 1.000000e+00 : f32
    %76 = vector.broadcast %cst_29 : f32 to vector<8x128xf32>
    %77 = arith.addf %76, %75 : vector<8x128xf32>
    %78 = arith.divf %76, %77 : vector<8x128xf32>
    %79 = vector.extract_strided_slice %61 {offsets = [0, 256], sizes = [8, 128], strides = [1, 1]} : vector<8x384xf32> to vector<8x128xf32>
    %80 = vector.extract_strided_slice %62 {offsets = [0, 256], sizes = [8, 128], strides = [1, 1]} : vector<8x384xf32> to vector<8x128xf32>
    %81 = arith.addf %80, %13 : vector<8x128xf32>
    %82 = arith.mulf %70, %81 : vector<8x128xf32>
    %83 = arith.addf %79, %82 : vector<8x128xf32>
    %84 = math.tanh %83 : vector<8x128xf32>
    %cst_30 = arith.constant 1.000000e+00 : f32
    %85 = vector.broadcast %cst_30 : f32 to vector<8x128xf32>
    %86 = arith.subf %85, %78 : vector<8x128xf32>
    %87 = arith.mulf %86, %84 : vector<8x128xf32>
    %88 = arith.mulf %78, %58 : vector<8x128xf32>
    %89 = arith.addf %87, %88 : vector<8x128xf32>
    %90 = vector.broadcast %c1_i32 : i32 to vector<8x1xi32>
    %91 = arith.cmpi slt, %90, %9 : vector<8x1xi32>
    %cst_31 = arith.constant 0.000000e+00 : f32
    %92 = vector.shape_cast %91 : vector<8x1xi1> to vector<8x1xi1>
    %93 = vector.broadcast %92 : vector<8x1xi1> to vector<8x128xi1>
    %94 = vector.broadcast %cst_31 : f32 to vector<8x128xf32>
    %95 = arith.select %93, %89, %94 : vector<8x128xi1>, vector<8x128xf32>
    %96 = arith.index_cast %c1_i32 : i32 to index
    %c0_32 = arith.constant 0 : index
    %c0_33 = arith.constant 0 : index
    %97 = vector.load %arg7[%96, %c0_32, %c0_33] : memref<8x8x128xf32, #tpu.memory_space<vmem>>, vector<1x8x128xf32>
    %98 = vector.shape_cast %97 : vector<1x8x128xf32> to vector<8x128xf32>
    %99 = vector.shape_cast %95 : vector<8x128xf32> to vector<1x8x128xf32>
    tpu.vector_store %arg7[%96, %c0_32, %c0_33], %99 {strides = array<i32>} : memref<8x8x128xf32, #tpu.memory_space<vmem>>, vector<1x8x128xf32>,
    %100 = vector.shape_cast %91 : vector<8x1xi1> to vector<8x1xi1>
    %101 = vector.broadcast %100 : vector<8x1xi1> to vector<8x128xi1>
    %102 = arith.select %101, %89, %58 : vector<8x128xi1>, vector<8x128xf32>
    %c2_i32 = arith.constant 2 : i32
    %103 = arith.index_cast %c2_i32 : i32 to index
    %c0_34 = arith.constant 0 : index
    %c0_35 = arith.constant 0 : index
    %104 = vector.load %arg9[%103, %c0_34, %c0_35] : memref<8x8x384xf32, #tpu.memory_space<vmem>>, vector<1x8x384xf32>
    %105 = vector.shape_cast %104 : vector<1x8x384xf32> to vector<8x384xf32>
    %cst_36 = arith.constant dense<0.000000e+00> : vector<8x384xf32>
    %106 = tpu.matmul %102, %10, %cst_36 {dimension_numbers = #tpu.dot_dimension_numbers<[1], [0], [0], [1], [0, 0, 1, 1], [], []>} : vector<8x128xf32>, vector<128x384xf32>, vector<8x384xf32> -> vector<8x384xf32>
    %107 = vector.extract_strided_slice %105 {offsets = [0, 0], sizes = [8, 128], strides = [1, 1]} : vector<8x384xf32> to vector<8x128xf32>
    %108 = vector.extract_strided_slice %106 {offsets = [0, 0], sizes = [8, 128], strides = [1, 1]} : vector<8x384xf32> to vector<8x128xf32>
    %109 = arith.addf %107, %108 : vector<8x128xf32>
    %110 = arith.negf %109 : vector<8x128xf32>
    %111 = math.exp %110 : vector<8x128xf32>
    %cst_37 = arith.constant 1.000000e+00 : f32
    %112 = vector.broadcast %cst_37 : f32 to vector<8x128xf32>
    %113 = arith.addf %112, %111 : vector<8x128xf32>
    %114 = arith.divf %112, %113 : vector<8x128xf32>
    %115 = vector.extract_strided_slice %105 {offsets = [0, 128], sizes = [8, 128], strides = [1, 1]} : vector<8x384xf32> to vector<8x128xf32>
    %116 = vector.extract_strided_slice %106 {offsets = [0, 128], sizes = [8, 128], strides = [1, 1]} : vector<8x384xf32> to vector<8x128xf32>
    %117 = arith.addf %115, %116 : vector<8x128xf32>
    %118 = arith.negf %117 : vector<8x128xf32>
    %119 = math.exp %118 : vector<8x128xf32>
    %cst_38 = arith.constant 1.000000e+00 : f32
    %120 = vector.broadcast %cst_38 : f32 to vector<8x128xf32>
    %121 = arith.addf %120, %119 : vector<8x128xf32>
    %122 = arith.divf %120, %121 : vector<8x128xf32>
    %123 = vector.extract_strided_slice %105 {offsets = [0, 256], sizes = [8, 128], strides = [1, 1]} : vector<8x384xf32> to vector<8x128xf32>
    %124 = vector.extract_strided_slice %106 {offsets = [0, 256], sizes = [8, 128], strides = [1, 1]} : vector<8x384xf32> to vector<8x128xf32>
    %125 = arith.addf %124, %13 : vector<8x128xf32>
    %126 = arith.mulf %114, %125 : vector<8x128xf32>
    %127 = arith.addf %123, %126 : vector<8x128xf32>
    %128 = math.tanh %127 : vector<8x128xf32>
    %cst_39 = arith.constant 1.000000e+00 : f32
    %129 = vector.broadcast %cst_39 : f32 to vector<8x128xf32>
    %130 = arith.subf %129, %122 : vector<8x128xf32>
    %131 = arith.mulf %130, %128 : vector<8x128xf32>
    %132 = arith.mulf %122, %102 : vector<8x128xf32>
    %133 = arith.addf %131, %132 : vector<8x128xf32>
    %134 = vector.broadcast %c2_i32 : i32 to vector<8x1xi32>
    %135 = arith.cmpi slt, %134, %9 : vector<8x1xi32>
    %cst_40 = arith.constant 0.000000e+00 : f32
    %136 = vector.shape_cast %135 : vector<8x1xi1> to vector<8x1xi1>
    %137 = vector.broadcast %136 : vector<8x1xi1> to vector<8x128xi1>
    %138 = vector.broadcast %cst_40 : f32 to vector<8x128xf32>
    %139 = arith.select %137, %133, %138 : vector<8x128xi1>, vector<8x128xf32>
    %140 = arith.index_cast %c2_i32 : i32 to index
    %c0_41 = arith.constant 0 : index
    %c0_42 = arith.constant 0 : index
    %141 = vector.load %arg7[%140, %c0_41, %c0_42] : memref<8x8x128xf32, #tpu.memory_space<vmem>>, vector<1x8x128xf32>
    %142 = vector.shape_cast %141 : vector<1x8x128xf32> to vector<8x128xf32>
    %143 = vector.shape_cast %139 : vector<8x128xf32> to vector<1x8x128xf32>
    tpu.vector_store %arg7[%140, %c0_41, %c0_42], %143 {strides = array<i32>} : memref<8x8x128xf32, #tpu.memory_space<vmem>>, vector<1x8x128xf32>,
    %144 = vector.shape_cast %135 : vector<8x1xi1> to vector<8x1xi1>
    %145 = vector.broadcast %144 : vector<8x1xi1> to vector<8x128xi1>
    %146 = arith.select %145, %133, %102 : vector<8x128xi1>, vector<8x128xf32>
    %c3_i32 = arith.constant 3 : i32
    %147 = arith.index_cast %c3_i32 : i32 to index
    %c0_43 = arith.constant 0 : index
    %c0_44 = arith.constant 0 : index
    %148 = vector.load %arg9[%147, %c0_43, %c0_44] : memref<8x8x384xf32, #tpu.memory_space<vmem>>, vector<1x8x384xf32>
    %149 = vector.shape_cast %148 : vector<1x8x384xf32> to vector<8x384xf32>
    %cst_45 = arith.constant dense<0.000000e+00> : vector<8x384xf32>
    %150 = tpu.matmul %146, %10, %cst_45 {dimension_numbers = #tpu.dot_dimension_numbers<[1], [0], [0], [1], [0, 0, 1, 1], [], []>} : vector<8x128xf32>, vector<128x384xf32>, vector<8x384xf32> -> vector<8x384xf32>
    %151 = vector.extract_strided_slice %149 {offsets = [0, 0], sizes = [8, 128], strides = [1, 1]} : vector<8x384xf32> to vector<8x128xf32>
    %152 = vector.extract_strided_slice %150 {offsets = [0, 0], sizes = [8, 128], strides = [1, 1]} : vector<8x384xf32> to vector<8x128xf32>
    %153 = arith.addf %151, %152 : vector<8x128xf32>
    %154 = arith.negf %153 : vector<8x128xf32>
    %155 = math.exp %154 : vector<8x128xf32>
    %cst_46 = arith.constant 1.000000e+00 : f32
    %156 = vector.broadcast %cst_46 : f32 to vector<8x128xf32>
    %157 = arith.addf %156, %155 : vector<8x128xf32>
    %158 = arith.divf %156, %157 : vector<8x128xf32>
    %159 = vector.extract_strided_slice %149 {offsets = [0, 128], sizes = [8, 128], strides = [1, 1]} : vector<8x384xf32> to vector<8x128xf32>
    %160 = vector.extract_strided_slice %150 {offsets = [0, 128], sizes = [8, 128], strides = [1, 1]} : vector<8x384xf32> to vector<8x128xf32>
    %161 = arith.addf %159, %160 : vector<8x128xf32>
    %162 = arith.negf %161 : vector<8x128xf32>
    %163 = math.exp %162 : vector<8x128xf32>
    %cst_47 = arith.constant 1.000000e+00 : f32
    %164 = vector.broadcast %cst_47 : f32 to vector<8x128xf32>
    %165 = arith.addf %164, %163 : vector<8x128xf32>
    %166 = arith.divf %164, %165 : vector<8x128xf32>
    %167 = vector.extract_strided_slice %149 {offsets = [0, 256], sizes = [8, 128], strides = [1, 1]} : vector<8x384xf32> to vector<8x128xf32>
    %168 = vector.extract_strided_slice %150 {offsets = [0, 256], sizes = [8, 128], strides = [1, 1]} : vector<8x384xf32> to vector<8x128xf32>
    %169 = arith.addf %168, %13 : vector<8x128xf32>
    %170 = arith.mulf %158, %169 : vector<8x128xf32>
    %171 = arith.addf %167, %170 : vector<8x128xf32>
    %172 = math.tanh %171 : vector<8x128xf32>
    %cst_48 = arith.constant 1.000000e+00 : f32
    %173 = vector.broadcast %cst_48 : f32 to vector<8x128xf32>
    %174 = arith.subf %173, %166 : vector<8x128xf32>
    %175 = arith.mulf %174, %172 : vector<8x128xf32>
    %176 = arith.mulf %166, %146 : vector<8x128xf32>
    %177 = arith.addf %175, %176 : vector<8x128xf32>
    %178 = vector.broadcast %c3_i32 : i32 to vector<8x1xi32>
    %179 = arith.cmpi slt, %178, %9 : vector<8x1xi32>
    %cst_49 = arith.constant 0.000000e+00 : f32
    %180 = vector.shape_cast %179 : vector<8x1xi1> to vector<8x1xi1>
    %181 = vector.broadcast %180 : vector<8x1xi1> to vector<8x128xi1>
    %182 = vector.broadcast %cst_49 : f32 to vector<8x128xf32>
    %183 = arith.select %181, %177, %182 : vector<8x128xi1>, vector<8x128xf32>
    %184 = arith.index_cast %c3_i32 : i32 to index
    %c0_50 = arith.constant 0 : index
    %c0_51 = arith.constant 0 : index
    %185 = vector.load %arg7[%184, %c0_50, %c0_51] : memref<8x8x128xf32, #tpu.memory_space<vmem>>, vector<1x8x128xf32>
    %186 = vector.shape_cast %185 : vector<1x8x128xf32> to vector<8x128xf32>
    %187 = vector.shape_cast %183 : vector<8x128xf32> to vector<1x8x128xf32>
    tpu.vector_store %arg7[%184, %c0_50, %c0_51], %187 {strides = array<i32>} : memref<8x8x128xf32, #tpu.memory_space<vmem>>, vector<1x8x128xf32>,
    %188 = vector.shape_cast %179 : vector<8x1xi1> to vector<8x1xi1>
    %189 = vector.broadcast %188 : vector<8x1xi1> to vector<8x128xi1>
    %190 = arith.select %189, %177, %146 : vector<8x128xi1>, vector<8x128xf32>
    %c4_i32 = arith.constant 4 : i32
    %191 = arith.index_cast %c4_i32 : i32 to index
    %c0_52 = arith.constant 0 : index
    %c0_53 = arith.constant 0 : index
    %192 = vector.load %arg9[%191, %c0_52, %c0_53] : memref<8x8x384xf32, #tpu.memory_space<vmem>>, vector<1x8x384xf32>
    %193 = vector.shape_cast %192 : vector<1x8x384xf32> to vector<8x384xf32>
    %cst_54 = arith.constant dense<0.000000e+00> : vector<8x384xf32>
    %194 = tpu.matmul %190, %10, %cst_54 {dimension_numbers = #tpu.dot_dimension_numbers<[1], [0], [0], [1], [0, 0, 1, 1], [], []>} : vector<8x128xf32>, vector<128x384xf32>, vector<8x384xf32> -> vector<8x384xf32>
    %195 = vector.extract_strided_slice %193 {offsets = [0, 0], sizes = [8, 128], strides = [1, 1]} : vector<8x384xf32> to vector<8x128xf32>
    %196 = vector.extract_strided_slice %194 {offsets = [0, 0], sizes = [8, 128], strides = [1, 1]} : vector<8x384xf32> to vector<8x128xf32>
    %197 = arith.addf %195, %196 : vector<8x128xf32>
    %198 = arith.negf %197 : vector<8x128xf32>
    %199 = math.exp %198 : vector<8x128xf32>
    %cst_55 = arith.constant 1.000000e+00 : f32
    %200 = vector.broadcast %cst_55 : f32 to vector<8x128xf32>
    %201 = arith.addf %200, %199 : vector<8x128xf32>
    %202 = arith.divf %200, %201 : vector<8x128xf32>
    %203 = vector.extract_strided_slice %193 {offsets = [0, 128], sizes = [8, 128], strides = [1, 1]} : vector<8x384xf32> to vector<8x128xf32>
    %204 = vector.extract_strided_slice %194 {offsets = [0, 128], sizes = [8, 128], strides = [1, 1]} : vector<8x384xf32> to vector<8x128xf32>
    %205 = arith.addf %203, %204 : vector<8x128xf32>
    %206 = arith.negf %205 : vector<8x128xf32>
    %207 = math.exp %206 : vector<8x128xf32>
    %cst_56 = arith.constant 1.000000e+00 : f32
    %208 = vector.broadcast %cst_56 : f32 to vector<8x128xf32>
    %209 = arith.addf %208, %207 : vector<8x128xf32>
    %210 = arith.divf %208, %209 : vector<8x128xf32>
    %211 = vector.extract_strided_slice %193 {offsets = [0, 256], sizes = [8, 128], strides = [1, 1]} : vector<8x384xf32> to vector<8x128xf32>
    %212 = vector.extract_strided_slice %194 {offsets = [0, 256], sizes = [8, 128], strides = [1, 1]} : vector<8x384xf32> to vector<8x128xf32>
    %213 = arith.addf %212, %13 : vector<8x128xf32>
    %214 = arith.mulf %202, %213 : vector<8x128xf32>
    %215 = arith.addf %211, %214 : vector<8x128xf32>
    %216 = math.tanh %215 : vector<8x128xf32>
    %cst_57 = arith.constant 1.000000e+00 : f32
    %217 = vector.broadcast %cst_57 : f32 to vector<8x128xf32>
    %218 = arith.subf %217, %210 : vector<8x128xf32>
    %219 = arith.mulf %218, %216 : vector<8x128xf32>
    %220 = arith.mulf %210, %190 : vector<8x128xf32>
    %221 = arith.addf %219, %220 : vector<8x128xf32>
    %222 = vector.broadcast %c4_i32 : i32 to vector<8x1xi32>
    %223 = arith.cmpi slt, %222, %9 : vector<8x1xi32>
    %cst_58 = arith.constant 0.000000e+00 : f32
    %224 = vector.shape_cast %223 : vector<8x1xi1> to vector<8x1xi1>
    %225 = vector.broadcast %224 : vector<8x1xi1> to vector<8x128xi1>
    %226 = vector.broadcast %cst_58 : f32 to vector<8x128xf32>
    %227 = arith.select %225, %221, %226 : vector<8x128xi1>, vector<8x128xf32>
    %228 = arith.index_cast %c4_i32 : i32 to index
    %c0_59 = arith.constant 0 : index
    %c0_60 = arith.constant 0 : index
    %229 = vector.load %arg7[%228, %c0_59, %c0_60] : memref<8x8x128xf32, #tpu.memory_space<vmem>>, vector<1x8x128xf32>
    %230 = vector.shape_cast %229 : vector<1x8x128xf32> to vector<8x128xf32>
    %231 = vector.shape_cast %227 : vector<8x128xf32> to vector<1x8x128xf32>
    tpu.vector_store %arg7[%228, %c0_59, %c0_60], %231 {strides = array<i32>} : memref<8x8x128xf32, #tpu.memory_space<vmem>>, vector<1x8x128xf32>,
    %232 = vector.shape_cast %223 : vector<8x1xi1> to vector<8x1xi1>
    %233 = vector.broadcast %232 : vector<8x1xi1> to vector<8x128xi1>
    %234 = arith.select %233, %221, %190 : vector<8x128xi1>, vector<8x128xf32>
    %c5_i32 = arith.constant 5 : i32
    %235 = arith.index_cast %c5_i32 : i32 to index
    %c0_61 = arith.constant 0 : index
    %c0_62 = arith.constant 0 : index
    %236 = vector.load %arg9[%235, %c0_61, %c0_62] : memref<8x8x384xf32, #tpu.memory_space<vmem>>, vector<1x8x384xf32>
    %237 = vector.shape_cast %236 : vector<1x8x384xf32> to vector<8x384xf32>
    %cst_63 = arith.constant dense<0.000000e+00> : vector<8x384xf32>
    %238 = tpu.matmul %234, %10, %cst_63 {dimension_numbers = #tpu.dot_dimension_numbers<[1], [0], [0], [1], [0, 0, 1, 1], [], []>} : vector<8x128xf32>, vector<128x384xf32>, vector<8x384xf32> -> vector<8x384xf32>
    %239 = vector.extract_strided_slice %237 {offsets = [0, 0], sizes = [8, 128], strides = [1, 1]} : vector<8x384xf32> to vector<8x128xf32>
    %240 = vector.extract_strided_slice %238 {offsets = [0, 0], sizes = [8, 128], strides = [1, 1]} : vector<8x384xf32> to vector<8x128xf32>
    %241 = arith.addf %239, %240 : vector<8x128xf32>
    %242 = arith.negf %241 : vector<8x128xf32>
    %243 = math.exp %242 : vector<8x128xf32>
    %cst_64 = arith.constant 1.000000e+00 : f32
    %244 = vector.broadcast %cst_64 : f32 to vector<8x128xf32>
    %245 = arith.addf %244, %243 : vector<8x128xf32>
    %246 = arith.divf %244, %245 : vector<8x128xf32>
    %247 = vector.extract_strided_slice %237 {offsets = [0, 128], sizes = [8, 128], strides = [1, 1]} : vector<8x384xf32> to vector<8x128xf32>
    %248 = vector.extract_strided_slice %238 {offsets = [0, 128], sizes = [8, 128], strides = [1, 1]} : vector<8x384xf32> to vector<8x128xf32>
    %249 = arith.addf %247, %248 : vector<8x128xf32>
    %250 = arith.negf %249 : vector<8x128xf32>
    %251 = math.exp %250 : vector<8x128xf32>
    %cst_65 = arith.constant 1.000000e+00 : f32
    %252 = vector.broadcast %cst_65 : f32 to vector<8x128xf32>
    %253 = arith.addf %252, %251 : vector<8x128xf32>
    %254 = arith.divf %252, %253 : vector<8x128xf32>
    %255 = vector.extract_strided_slice %237 {offsets = [0, 256], sizes = [8, 128], strides = [1, 1]} : vector<8x384xf32> to vector<8x128xf32>
    %256 = vector.extract_strided_slice %238 {offsets = [0, 256], sizes = [8, 128], strides = [1, 1]} : vector<8x384xf32> to vector<8x128xf32>
    %257 = arith.addf %256, %13 : vector<8x128xf32>
    %258 = arith.mulf %246, %257 : vector<8x128xf32>
    %259 = arith.addf %255, %258 : vector<8x128xf32>
    %260 = math.tanh %259 : vector<8x128xf32>
    %cst_66 = arith.constant 1.000000e+00 : f32
    %261 = vector.broadcast %cst_66 : f32 to vector<8x128xf32>
    %262 = arith.subf %261, %254 : vector<8x128xf32>
    %263 = arith.mulf %262, %260 : vector<8x128xf32>
    %264 = arith.mulf %254, %234 : vector<8x128xf32>
    %265 = arith.addf %263, %264 : vector<8x128xf32>
    %266 = vector.broadcast %c5_i32 : i32 to vector<8x1xi32>
    %267 = arith.cmpi slt, %266, %9 : vector<8x1xi32>
    %cst_67 = arith.constant 0.000000e+00 : f32
    %268 = vector.shape_cast %267 : vector<8x1xi1> to vector<8x1xi1>
    %269 = vector.broadcast %268 : vector<8x1xi1> to vector<8x128xi1>
    %270 = vector.broadcast %cst_67 : f32 to vector<8x128xf32>
    %271 = arith.select %269, %265, %270 : vector<8x128xi1>, vector<8x128xf32>
    %272 = arith.index_cast %c5_i32 : i32 to index
    %c0_68 = arith.constant 0 : index
    %c0_69 = arith.constant 0 : index
    %273 = vector.load %arg7[%272, %c0_68, %c0_69] : memref<8x8x128xf32, #tpu.memory_space<vmem>>, vector<1x8x128xf32>
    %274 = vector.shape_cast %273 : vector<1x8x128xf32> to vector<8x128xf32>
    %275 = vector.shape_cast %271 : vector<8x128xf32> to vector<1x8x128xf32>
    tpu.vector_store %arg7[%272, %c0_68, %c0_69], %275 {strides = array<i32>} : memref<8x8x128xf32, #tpu.memory_space<vmem>>, vector<1x8x128xf32>,
    %276 = vector.shape_cast %267 : vector<8x1xi1> to vector<8x1xi1>
    %277 = vector.broadcast %276 : vector<8x1xi1> to vector<8x128xi1>
    %278 = arith.select %277, %265, %234 : vector<8x128xi1>, vector<8x128xf32>
    %c6_i32 = arith.constant 6 : i32
    %279 = arith.index_cast %c6_i32 : i32 to index
    %c0_70 = arith.constant 0 : index
    %c0_71 = arith.constant 0 : index
    %280 = vector.load %arg9[%279, %c0_70, %c0_71] : memref<8x8x384xf32, #tpu.memory_space<vmem>>, vector<1x8x384xf32>
    %281 = vector.shape_cast %280 : vector<1x8x384xf32> to vector<8x384xf32>
    %cst_72 = arith.constant dense<0.000000e+00> : vector<8x384xf32>
    %282 = tpu.matmul %278, %10, %cst_72 {dimension_numbers = #tpu.dot_dimension_numbers<[1], [0], [0], [1], [0, 0, 1, 1], [], []>} : vector<8x128xf32>, vector<128x384xf32>, vector<8x384xf32> -> vector<8x384xf32>
    %283 = vector.extract_strided_slice %281 {offsets = [0, 0], sizes = [8, 128], strides = [1, 1]} : vector<8x384xf32> to vector<8x128xf32>
    %284 = vector.extract_strided_slice %282 {offsets = [0, 0], sizes = [8, 128], strides = [1, 1]} : vector<8x384xf32> to vector<8x128xf32>
    %285 = arith.addf %283, %284 : vector<8x128xf32>
    %286 = arith.negf %285 : vector<8x128xf32>
    %287 = math.exp %286 : vector<8x128xf32>
    %cst_73 = arith.constant 1.000000e+00 : f32
    %288 = vector.broadcast %cst_73 : f32 to vector<8x128xf32>
    %289 = arith.addf %288, %287 : vector<8x128xf32>
    %290 = arith.divf %288, %289 : vector<8x128xf32>
    %291 = vector.extract_strided_slice %281 {offsets = [0, 128], sizes = [8, 128], strides = [1, 1]} : vector<8x384xf32> to vector<8x128xf32>
    %292 = vector.extract_strided_slice %282 {offsets = [0, 128], sizes = [8, 128], strides = [1, 1]} : vector<8x384xf32> to vector<8x128xf32>
    %293 = arith.addf %291, %292 : vector<8x128xf32>
    %294 = arith.negf %293 : vector<8x128xf32>
    %295 = math.exp %294 : vector<8x128xf32>
    %cst_74 = arith.constant 1.000000e+00 : f32
    %296 = vector.broadcast %cst_74 : f32 to vector<8x128xf32>
    %297 = arith.addf %296, %295 : vector<8x128xf32>
    %298 = arith.divf %296, %297 : vector<8x128xf32>
    %299 = vector.extract_strided_slice %281 {offsets = [0, 256], sizes = [8, 128], strides = [1, 1]} : vector<8x384xf32> to vector<8x128xf32>
    %300 = vector.extract_strided_slice %282 {offsets = [0, 256], sizes = [8, 128], strides = [1, 1]} : vector<8x384xf32> to vector<8x128xf32>
    %301 = arith.addf %300, %13 : vector<8x128xf32>
    %302 = arith.mulf %290, %301 : vector<8x128xf32>
    %303 = arith.addf %299, %302 : vector<8x128xf32>
    %304 = math.tanh %303 : vector<8x128xf32>
    %cst_75 = arith.constant 1.000000e+00 : f32
    %305 = vector.broadcast %cst_75 : f32 to vector<8x128xf32>
    %306 = arith.subf %305, %298 : vector<8x128xf32>
    %307 = arith.mulf %306, %304 : vector<8x128xf32>
    %308 = arith.mulf %298, %278 : vector<8x128xf32>
    %309 = arith.addf %307, %308 : vector<8x128xf32>
    %310 = vector.broadcast %c6_i32 : i32 to vector<8x1xi32>
    %311 = arith.cmpi slt, %310, %9 : vector<8x1xi32>
    %cst_76 = arith.constant 0.000000e+00 : f32
    %312 = vector.shape_cast %311 : vector<8x1xi1> to vector<8x1xi1>
    %313 = vector.broadcast %312 : vector<8x1xi1> to vector<8x128xi1>
    %314 = vector.broadcast %cst_76 : f32 to vector<8x128xf32>
    %315 = arith.select %313, %309, %314 : vector<8x128xi1>, vector<8x128xf32>
    %316 = arith.index_cast %c6_i32 : i32 to index
    %c0_77 = arith.constant 0 : index
    %c0_78 = arith.constant 0 : index
    %317 = vector.load %arg7[%316, %c0_77, %c0_78] : memref<8x8x128xf32, #tpu.memory_space<vmem>>, vector<1x8x128xf32>
    %318 = vector.shape_cast %317 : vector<1x8x128xf32> to vector<8x128xf32>
    %319 = vector.shape_cast %315 : vector<8x128xf32> to vector<1x8x128xf32>
    tpu.vector_store %arg7[%316, %c0_77, %c0_78], %319 {strides = array<i32>} : memref<8x8x128xf32, #tpu.memory_space<vmem>>, vector<1x8x128xf32>,
    %320 = vector.shape_cast %311 : vector<8x1xi1> to vector<8x1xi1>
    %321 = vector.broadcast %320 : vector<8x1xi1> to vector<8x128xi1>
    %322 = arith.select %321, %309, %278 : vector<8x128xi1>, vector<8x128xf32>
    %c7_i32 = arith.constant 7 : i32
    %323 = arith.index_cast %c7_i32 : i32 to index
    %c0_79 = arith.constant 0 : index
    %c0_80 = arith.constant 0 : index
    %324 = vector.load %arg9[%323, %c0_79, %c0_80] : memref<8x8x384xf32, #tpu.memory_space<vmem>>, vector<1x8x384xf32>
    %325 = vector.shape_cast %324 : vector<1x8x384xf32> to vector<8x384xf32>
    %cst_81 = arith.constant dense<0.000000e+00> : vector<8x384xf32>
    %326 = tpu.matmul %322, %10, %cst_81 {dimension_numbers = #tpu.dot_dimension_numbers<[1], [0], [0], [1], [0, 0, 1, 1], [], []>} : vector<8x128xf32>, vector<128x384xf32>, vector<8x384xf32> -> vector<8x384xf32>
    %327 = vector.extract_strided_slice %325 {offsets = [0, 0], sizes = [8, 128], strides = [1, 1]} : vector<8x384xf32> to vector<8x128xf32>
    %328 = vector.extract_strided_slice %326 {offsets = [0, 0], sizes = [8, 128], strides = [1, 1]} : vector<8x384xf32> to vector<8x128xf32>
    %329 = arith.addf %327, %328 : vector<8x128xf32>
    %330 = arith.negf %329 : vector<8x128xf32>
    %331 = math.exp %330 : vector<8x128xf32>
    %cst_82 = arith.constant 1.000000e+00 : f32
    %332 = vector.broadcast %cst_82 : f32 to vector<8x128xf32>
    %333 = arith.addf %332, %331 : vector<8x128xf32>
    %334 = arith.divf %332, %333 : vector<8x128xf32>
    %335 = vector.extract_strided_slice %325 {offsets = [0, 128], sizes = [8, 128], strides = [1, 1]} : vector<8x384xf32> to vector<8x128xf32>
    %336 = vector.extract_strided_slice %326 {offsets = [0, 128], sizes = [8, 128], strides = [1, 1]} : vector<8x384xf32> to vector<8x128xf32>
    %337 = arith.addf %335, %336 : vector<8x128xf32>
    %338 = arith.negf %337 : vector<8x128xf32>
    %339 = math.exp %338 : vector<8x128xf32>
    %cst_83 = arith.constant 1.000000e+00 : f32
    %340 = vector.broadcast %cst_83 : f32 to vector<8x128xf32>
    %341 = arith.addf %340, %339 : vector<8x128xf32>
    %342 = arith.divf %340, %341 : vector<8x128xf32>
    %343 = vector.extract_strided_slice %325 {offsets = [0, 256], sizes = [8, 128], strides = [1, 1]} : vector<8x384xf32> to vector<8x128xf32>
    %344 = vector.extract_strided_slice %326 {offsets = [0, 256], sizes = [8, 128], strides = [1, 1]} : vector<8x384xf32> to vector<8x128xf32>
    %345 = arith.addf %344, %13 : vector<8x128xf32>
    %346 = arith.mulf %334, %345 : vector<8x128xf32>
    %347 = arith.addf %343, %346 : vector<8x128xf32>
    %348 = math.tanh %347 : vector<8x128xf32>
    %cst_84 = arith.constant 1.000000e+00 : f32
    %349 = vector.broadcast %cst_84 : f32 to vector<8x128xf32>
    %350 = arith.subf %349, %342 : vector<8x128xf32>
    %351 = arith.mulf %350, %348 : vector<8x128xf32>
    %352 = arith.mulf %342, %322 : vector<8x128xf32>
    %353 = arith.addf %351, %352 : vector<8x128xf32>
    %354 = vector.broadcast %c7_i32 : i32 to vector<8x1xi32>
    %355 = arith.cmpi slt, %354, %9 : vector<8x1xi32>
    %cst_85 = arith.constant 0.000000e+00 : f32
    %356 = vector.shape_cast %355 : vector<8x1xi1> to vector<8x1xi1>
    %357 = vector.broadcast %356 : vector<8x1xi1> to vector<8x128xi1>
    %358 = vector.broadcast %cst_85 : f32 to vector<8x128xf32>
    %359 = arith.select %357, %353, %358 : vector<8x128xi1>, vector<8x128xf32>
    %360 = arith.index_cast %c7_i32 : i32 to index
    %c0_86 = arith.constant 0 : index
    %c0_87 = arith.constant 0 : index
    %361 = vector.load %arg7[%360, %c0_86, %c0_87] : memref<8x8x128xf32, #tpu.memory_space<vmem>>, vector<1x8x128xf32>
    %362 = vector.shape_cast %361 : vector<1x8x128xf32> to vector<8x128xf32>
    %363 = vector.shape_cast %359 : vector<8x128xf32> to vector<1x8x128xf32>
    tpu.vector_store %arg7[%360, %c0_86, %c0_87], %363 {strides = array<i32>} : memref<8x8x128xf32, #tpu.memory_space<vmem>>, vector<1x8x128xf32>,
    %364 = vector.shape_cast %355 : vector<8x1xi1> to vector<8x1xi1>
    %365 = vector.broadcast %364 : vector<8x1xi1> to vector<8x128xi1>
    %366 = arith.select %365, %353, %322 : vector<8x128xi1>, vector<8x128xf32>
    %c8_i32 = arith.constant 8 : i32
    %c0_88 = arith.constant 0 : index
    %c0_89 = arith.constant 0 : index
    %367 = vector.load %arg8[%c0_88, %c0_89] : memref<8x128xf32, #tpu.memory_space<vmem>>, vector<8x128xf32>
    tpu.vector_store %arg8[%c0_88, %c0_89], %366 {strides = array<i32>} : memref<8x128xf32, #tpu.memory_space<vmem>>, vector<8x128xf32>,
    return
  }
  func.func @transform_0(%arg0: i32) -> (i32, i32, i32) {
    %c0_i32 = arith.constant 0 : i32
    %c0_i32_0 = arith.constant 0 : i32
    %c0_i32_1 = arith.constant 0 : i32
    return %c0_i32, %arg0, %c0_i32_0 : i32, i32, i32
  }
  func.func @transform_1(%arg0: i32) -> (i32, i32) {
    %c0_i32 = arith.constant 0 : i32
    %c0_i32_0 = arith.constant 0 : i32
    return %arg0, %c0_i32 : i32, i32
  }
  func.func @transform_2(%arg0: i32) -> (i32, i32) {
    %c0_i32 = arith.constant 0 : i32
    %c0_i32_0 = arith.constant 0 : i32
    %c0_i32_1 = arith.constant 0 : i32
    return %c0_i32, %c0_i32_0 : i32, i32
  }
  func.func @transform_3(%arg0: i32) -> (i32, i32) {
    %c0_i32 = arith.constant 0 : i32
    %c0_i32_0 = arith.constant 0 : i32
    %c0_i32_1 = arith.constant 0 : i32
    return %c0_i32, %c0_i32_0 : i32, i32
  }
  func.func @transform_4(%arg0: i32) -> (i32, i32) {
    %c0_i32 = arith.constant 0 : i32
    %c0_i32_0 = arith.constant 0 : i32
    %c0_i32_1 = arith.constant 0 : i32
    return %c0_i32, %c0_i32_0 : i32, i32
  }
  func.func @transform_5(%arg0: i32) -> (i32, i32) {
    %c0_i32 = arith.constant 0 : i32
    %c0_i32_0 = arith.constant 0 : i32
    %c0_i32_1 = arith.constant 0 : i32
    return %c0_i32, %c0_i32_0 : i32, i32
  }
  func.func @transform_6(%arg0: i32) -> (i32, i32, i32) {
    %c0_i32 = arith.constant 0 : i32
    %c0_i32_0 = arith.constant 0 : i32
    %c0_i32_1 = arith.constant 0 : i32
    return %c0_i32, %arg0, %c0_i32_0 : i32, i32, i32
  }
  func.func @transform_7(%arg0: i32) -> (i32, i32) {
    %c0_i32 = arith.constant 0 : i32
    %c0_i32_0 = arith.constant 0 : i32
    return %arg0, %c0_i32 : i32, i32
  }
}

</mosaic_0001>

<bundles_post_ra>
// kernel: string_query_encoder_forward.1
= control target key start
LH: loop header
LB: loop body
LE: loop exit
PB: predicated region body
PF: predicated region fallthrough
CT: control target
= control target key end

     0   :  { %v3902_v3 = vmov 0.0   ;;  %v3900_v4 = vmov 0   ;;  %vm2464_vm4 = vmmov 0   ;;  %s3892_s2 = inlined_call_operand.vmem [shape: f32[128,384], index: 2, kind: input, shape index: {}]   ;;  %s3893_s0 = inlined_call_operand.vmem [shape: f32[8,8,128], index: 0, kind: input, shape index: {}]   ;;  %s3894_s3 = inlined_call_operand.vmem [shape: f32[128,384], index: 3, kind: input, shape index: {}]   ;;  %s3895_s1 = inlined_call_operand.vmem [shape: s32[8,1], index: 1, kind: input, shape index: {}]   ;;  %s3896_s4 = inlined_call_operand.vmem [shape: f32[1,384], index: 4, kind: input, shape index: {}]   ;;  %s3897_s5 = inlined_call_operand.vmem [shape: f32[1,128], index: 5, kind: input, shape index: {}]   ;;  %s3898_s6 = inlined_call_operand.vmem [shape: f32[8,8,128], index: 6, kind: output, shape index: {0}]   ;;  %s3899_s7 = inlined_call_operand.vmem [shape: f32[8,128], index: 7, kind: output, shape index: {1}]  }
   0x1   :  { %v79_v0 = vld [vmem:[%s3892_s2 + $0x170] sm:$0xff]  ;;  %v78_v1 = vld [vmem:[%s3892_s2 + $0x168] sm:$0xff]  ;;  %v76_v2 = vld [vmem:[%s3892_s2 + $0x158] sm:$0xff]  ;;  %162 = vmatprep.mubr.f32.mxu0 %v3902_v3  ;;  %2331 = vset.pattern.permute.xlu0 %v3900_v4 }
   0x2   :  { %98 = vmatprep.subr.mxu0 %v79_v0  ;;  %v75_v5 = vld [vmem:[%s3892_s2 + $0x150] sm:$0xff]  ;;  %2332 = vset.pattern.permute.xlu1 %v3900_v4  ;;  %v73_v6 = vld [vmem:[%s3892_s2 + $0x140] sm:$0xff]  ;;  %v72_v7 = vld [vmem:[%s3892_s2 + $0x138] sm:$0xff] }
   0x3   :  { %99 = vmatpush1.msra.mxu0 %v78_v1  ;;  %v70_v8 = vld [vmem:[%s3892_s2 + $0x128] sm:$0xff]  ;;  %v69_v9 = vld [vmem:[%s3892_s2 + $0x120] sm:$0xff]  ;;  %v67_v10 = vld [vmem:[%s3892_s2 + $0x110] sm:$0xff] }
   0x4   :  { %100 = vmatprep.subr.mxu0 %v76_v2  ;;  %v66_v11 = vld [vmem:[%s3892_s2 + $0x108] sm:$0xff]  ;;  %v64_v12 = vld [vmem:[%s3892_s2 + $0xf8] sm:$0xff]  ;;  %v63_v13 = vld [vmem:[%s3892_s2 + $0xf0] sm:$0xff] }
   0x5   :  { %101 = vmatpush1.msra.mxu0 %v75_v5  ;;  %v61_v14 = vld [vmem:[%s3892_s2 + $0xe0] sm:$0xff]  ;;  %v80_v15 = vld [vmem:[%s3892_s2 + $0x178] sm:$0xff]  ;;  %v58_v18 = vld [vmem:[%s3892_s2 + $0xc8] sm:$0xff] }
   0x6   :  { %102 = vmatprep.subr.mxu0 %v73_v6  ;;  %v60_v16 = vld [vmem:[%s3892_s2 + $0xd8] sm:$0xff]  ;;  %2004 = vmatprep.subr.mxu1 %v80_v15  ;;  %v77_v17 = vld [vmem:[%s3892_s2 + $0x160] sm:$0xff]  ;;  %v74_v19 = vld [vmem:[%s3892_s2 + $0x148] sm:$0xff] }
   0x7   :  { %103 = vmatpush1.msra.mxu0 %v72_v7  ;;  %2005 = vmatpush3.msra.mxu1 %v80_v15  ;;  %v57_v20 = vld [vmem:[%s3892_s2 + $0xc0] sm:$0xff]  ;;  %v55_v21 = vld [vmem:[%s3892_s2 + $0xb0] sm:$0xff]  ;;  %v54_v23 = vld [vmem:[%s3892_s2 + $0xa8] sm:$0xff] }
   0x8   :  { %104 = vmatprep.subr.mxu0 %v70_v8  ;;  %2006 = vmatprep.subr.mxu1 %v77_v17  ;;  %v71_v22 = vld [vmem:[%s3892_s2 + $0x130] sm:$0xff]  ;;  %v52_v24 = vld [vmem:[%s3892_s2 + $0x98] sm:$0xff]  ;;  %v49_v27 = vld [vmem:[%s3892_s2 + $0x80] sm:$0xff] }
   0x9   :  { %105 = vmatpush1.msra.mxu0 %v69_v9  ;;  %2007 = vmatpush3.msra.mxu1 %v77_v17  ;;  %v68_v25 = vld [vmem:[%s3892_s2 + $0x118] sm:$0xff]  ;;  %v51_v26 = vld [vmem:[%s3892_s2 + $0x90] sm:$0xff]  ;;  %v65_v28 = vld [vmem:[%s3892_s2 + $0x100] sm:$0xff] }
   0xa   :  { %106 = vmatprep.subr.mxu0 %v67_v10  ;;  %2008 = vmatprep.subr.mxu1 %v74_v19  ;;  %v48_v29 = vld [vmem:[%s3892_s2 + $0x78] sm:$0xff]  ;;  %v46_v30 = vld [vmem:[%s3892_s2 + $0x68] sm:$0xff]  ;;  %v45_v32 = vld [vmem:[%s3892_s2 + $0x60] sm:$0xff] }
   0xb   :  { %107 = vmatpush1.msra.mxu0 %v66_v11  ;;  %2009 = vmatpush3.msra.mxu1 %v74_v19  ;;  %v62_v31 = vld [vmem:[%s3892_s2 + $0xe8] sm:$0xff]  ;;  %v43_v33 = vld [vmem:[%s3892_s2 + $0x50] sm:$0xff]  ;;  %v40_v36 = vld [vmem:[%s3892_s2 + $0x38] sm:$0xff] }
   0xc   :  { %108 = vmatprep.subr.mxu0 %v64_v12  ;;  %2010 = vmatprep.subr.mxu1 %v71_v22  ;;  %v59_v34 = vld [vmem:[%s3892_s2 + $0xd0] sm:$0xff]  ;;  %v42_v35 = vld [vmem:[%s3892_s2 + $0x48] sm:$0xff]  ;;  %v56_v37 = vld [vmem:[%s3892_s2 + $0xb8] sm:$0xff] }
   0xd   :  { %109 = vmatpush1.msra.mxu0 %v63_v13  ;;  %2011 = vmatpush3.msra.mxu1 %v71_v22  ;;  %v39_v38 = vld [vmem:[%s3892_s2 + $0x30] sm:$0xff]  ;;  %v37_v39 = vld [vmem:[%s3892_s2 + $0x20] sm:$0xff]  ;;  %v36_v41 = vld [vmem:[%s3892_s2 + $0x18] sm:$0xff] }
   0xe   :  { %110 = vmatprep.subr.mxu0 %v61_v14  ;;  %2012 = vmatprep.subr.mxu1 %v68_v25  ;;  %v53_v40 = vld [vmem:[%s3892_s2 + $0xa0] sm:$0xff]  ;;  %v34_v42 = vld [vmem:[%s3892_s2 + $0x8] sm:$0xff]  ;;  %v2645_v46 = vld [vmem:[%s3894_s3 + $0x170] sm:$0xff] }
   0xf   :  { %111 = vmatpush1.msra.mxu0 %v60_v16  ;;  %2013 = vmatpush3.msra.mxu1 %v68_v25  ;;  %v50_v43 = vld [vmem:[%s3892_s2 + $0x88] sm:$0xff]  ;;  %v33_v44 = vld [vmem:[%s3892_s2] sm:$0xff]  ;;  %3926 = vst [vmem:[#allocation3_spill] sm:$0xff] %v2645_v46  ;;  %v2655_v48 = vld [vmem:[%s3894_s3 + $0x158] sm:$0xff] }
  0x10   :  { %112 = vmatprep.subr.mxu0 %v58_v18  ;;  %2014 = vmatprep.subr.mxu1 %v65_v28  ;;  %v2640_v45 = vld [vmem:[%s3893_s0] sm:$0xff]  ;;  %v2650_v47 = vld [vmem:[%s3894_s3 + $0x168] sm:$0xff]  ;;  %v47_v49 = vld [vmem:[%s3892_s2 + $0x70] sm:$0xff] }
  0x11   :  { %113 = vmatpush1.msra.mxu0 %v57_v20  ;;  %2015 = vmatpush3.msra.mxu1 %v65_v28  ;;  %v2665_v50 = vld [vmem:[%s3894_s3 + $0x150] sm:$0xff]  ;;  %v2672_v51 = vld [vmem:[%s3893_s0 + $0x8] sm:$0xff]  ;;  %v2677_v52 = vld [vmem:[%s3894_s3 + $0x140] sm:$0xff] }
  0x12   :  { %114 = vmatprep.subr.mxu0 %v55_v21  ;;  %2016 = vmatprep.subr.mxu1 %v62_v31  ;;  %v2683_v53 = vld [vmem:[%s3894_s3 + $0x138] sm:$0xff]  ;;  %v2689_v54 = vld [vmem:[%s3894_s3 + $0x128] sm:$0xff]  ;;  %v2699_v56 = vld [vmem:[%s3894_s3 + $0x120] sm:$0xff] }
  0x13   :  { %115 = vmatpush1.msra.mxu0 %v54_v23  ;;  %2017 = vmatpush3.msra.mxu1 %v62_v31  ;;  %v44_v55 = vld [vmem:[%s3892_s2 + $0x58] sm:$0xff]  ;;  %v2706_v57 = vld [vmem:[%s3893_s0 + $0x10] sm:$0xff]  ;;  %v2717_v59 = vld [vmem:[%s3894_s3 + $0x108] sm:$0xff] }
  0x14   :  { %116 = vmatprep.subr.mxu0 %v52_v24  ;;  %2018 = vmatprep.subr.mxu1 %v59_v34  ;;  %v2711_v58 = vld [vmem:[%s3894_s3 + $0x110] sm:$0xff]  ;;  %v2723_v60 = vld [vmem:[%s3894_s3 + $0xf8] sm:$0xff]  ;;  %v41_v61 = vld [vmem:[%s3892_s2 + $0x40] sm:$0xff] }
  0x15   :  { %117 = vmatpush1.msra.mxu0 %v51_v26  ;;  %2019 = vmatpush3.msra.mxu1 %v59_v34  ;;  %v2733_v62 = vld [vmem:[%s3894_s3 + $0xf0] sm:$0xff]  ;;  %v2740_v63 = vld [vmem:[%s3893_s0 + $0x18] sm:$0xff]  ;;  %v2745_v0 = vld [vmem:[%s3894_s3 + $0xe0] sm:$0xff] }
  0x16   :  { %118 = vmatprep.subr.mxu0 %v49_v27  ;;  %2020 = vmatprep.subr.mxu1 %v56_v37  ;;  %v2751_v1 = vld [vmem:[%s3894_s3 + $0xd8] sm:$0xff]  ;;  %v2757_v2 = vld [vmem:[%s3894_s3 + $0xc8] sm:$0xff]  ;;  %v2767_v6 = vld [vmem:[%s3894_s3 + $0xc0] sm:$0xff] }
  0x17   :  { %119 = vmatpush1.msra.mxu0 %v48_v29  ;;  %2021 = vmatpush3.msra.mxu1 %v56_v37  ;;  %v38_v5 = vld [vmem:[%s3892_s2 + $0x28] sm:$0xff]  ;;  %v2774_v7 = vld [vmem:[%s3893_s0 + $0x20] sm:$0xff]  ;;  %v2779_v8 = vld [vmem:[%s3894_s3 + $0xb0] sm:$0xff] }
  0x18   :  { %120 = vmatprep.subr.mxu0 %v46_v30  ;;  %2022 = vmatprep.subr.mxu1 %v53_v40  ;;  %v2785_v9 = vld [vmem:[%s3894_s3 + $0xa8] sm:$0xff]  ;;  %v2791_v10 = vld [vmem:[%s3894_s3 + $0x98] sm:$0xff]  ;;  %v35_v11 = vld [vmem:[%s3892_s2 + $0x10] sm:$0xff] }
  0x19   :  { %121 = vmatpush1.msra.mxu0 %v45_v32  ;;  %2023 = vmatpush3.msra.mxu1 %v53_v40  ;;  %v2801_v12 = vld [vmem:[%s3894_s3 + $0x90] sm:$0xff]  ;;  %v2808_v13 = vld [vmem:[%s3893_s0 + $0x28] sm:$0xff]  ;;  %v2813_v14 = vld [vmem:[%s3894_s3 + $0x80] sm:$0xff] }
  0x1a   :  { %122 = vmatprep.subr.mxu0 %v43_v33  ;;  %2024 = vmatprep.subr.mxu1 %v50_v43  ;;  %v2819_v15 = vld [vmem:[%s3894_s3 + $0x78] sm:$0xff]  ;;  %v2825_v16 = vld [vmem:[%s3894_s3 + $0x68] sm:$0xff]  ;;  %v2832_v17 = vld [vmem:[%s3894_s3 + $0x60] sm:$0xff] }
  0x1b   :  { %123 = vmatpush1.msra.mxu0 %v42_v35  ;;  %2025 = vmatpush3.msra.mxu1 %v50_v43  ;;  %v31_v18 = vld [vmem:[%s3893_s0 + $0x30] sm:$0xff]  ;;  %v2848_v20 = vld [vmem:[%s3894_s3 + $0x48] sm:$0xff]  ;;  %v2855_v21 = vld [vmem:[%s3894_s3 + $0x38] sm:$0xff] }
  0x1c   :  { %124 = vmatprep.subr.mxu0 %v40_v36  ;;  %2026 = vmatprep.subr.mxu1 %v47_v49  ;;  %v2842_v19 = vld [vmem:[%s3894_s3 + $0x50] sm:$0xff]  ;;  %v2867_v23 = vld [vmem:[%s3894_s3 + $0x178] sm:$0xff]  ;;  %v2877_v25 = vld [vmem:[%s3894_s3 + $0x20] sm:$0xff] }
  0x1d   :  { %125 = vmatpush1.msra.mxu0 %v39_v38  ;;  %2027 = vmatpush3.msra.mxu1 %v47_v49  ;;  %v2862_v22 = vld [vmem:[%s3894_s3 + $0x30] sm:$0xff]  ;;  %v32_v24 = vld [vmem:[%s3893_s0 + $0x38] sm:$0xff]  ;;  %v2890_v27 = vld [vmem:[%s3894_s3 + $0x8] sm:$0xff] }
  0x1e   :  { %126 = vmatprep.subr.mxu0 %v37_v39  ;;  %2028 = vmatprep.subr.mxu1 %v44_v55  ;;  %v2883_v26 = vld [vmem:[%s3894_s3 + $0x18] sm:$0xff]  ;;  %3928 = vst [vmem:[#allocation5_spill] sm:$0xff] %v2890_v27  ;;  %v2896_v28 = vld [vmem:[%s3895_s1] sm:$0xff]  ;;  %v2916_v31 = vld [vmem:[%s3894_s3 + $0x148] sm:$0xff] }
  0x1f   :  { %127 = vmatpush1.msra.mxu0 %v36_v41  ;;  %2029 = vmatpush3.msra.mxu1 %v44_v55  ;;  %3927 = vst [vmem:[#allocation4_spill] sm:$0xff] %v2883_v26  ;;  %3929 = vst [vmem:[#allocation6_spill] sm:$0xff] %v2896_v28  ;;  %v2902_v29 = vld [vmem:[%s3894_s3] sm:$0xff]  ;;  %vm562_vm0 = vcmp.gt.s32.totalorder %v2896_v28, 0  ;;  %v2926_v32 = vld [vmem:[%s3894_s3 + $0x130] sm:$0xff]  ;;  %vm737_vm1 = vcmp.gt.s32.totalorder %v2896_v28, 1 }
  0x20   :  { %128 = vmatprep.subr.mxu0 %v34_v42  ;;  %2030 = vmatprep.subr.mxu1 %v41_v61  ;;  %3930 = vst [vmem:[#allocation7_spill] sm:$0xff] %v2902_v29  ;;  %v2907_v30 = vld [vmem:[%s3894_s3 + $0x160] sm:$0xff]  ;;  %v563_v33 = vsel %vm562_vm0, 1, %v3900_v4  ;;  %v2935_v34 = vld [vmem:[%s3894_s3 + $0x118] sm:$0xff]  ;;  %v738_v36 = vsel %vm737_vm1, 1, %v3900_v4  ;;  %v2954_v37 = vld [vmem:[%s3894_s3 + $0xe8] sm:$0xff] }
  0x21   :  { %129 = vmatpush1.msra.mxu0 %v33_v44  ;;  %2031 = vmatpush3.msra.mxu1 %v41_v61  ;;  %v2945_v35 = vld [vmem:[%s3894_s3 + $0x100] sm:$0xff]  ;;  %vm1268_vm2 = vcmp.gt.s32.totalorder %v2896_v28, 4  ;;  %v2963_v38 = vld [vmem:[%s3894_s3 + $0xd0] sm:$0xff]  ;;  %v2972_v40 = vld [vmem:[%s3894_s3 + $0xb8] sm:$0xff]  ;;  %vm1622_vm3 = vcmp.gt.s32.totalorder %v2896_v28, 6 }
  0x22   :  { %163 = vmatmul.mubr.f32.vlgmr.msra.gmra.mxu0 %v2640_v45  ;;  %399 = vmatprep.subr.mxu0 %v2645_v46  ;;  %v1269_v39 = vsel %vm1268_vm2, 1, %v3900_v4  ;;  %v2982_v41 = vld [vmem:[%s3894_s3 + $0xa0] sm:$0xff]  ;;  %v1623_v42 = vsel %vm1622_vm3, 1, %v3900_v4  ;;  %v2991_v43 = vld [vmem:[%s3894_s3 + $0x88] sm:$0xff]  ;;  %v3000_v44 = vld [vmem:[%s3894_s3 + $0x70] sm:$0xff] }
  0x23   :  { %400 = vmatpush1.msra.mxu0 %v2650_v47  ;;  %168 = vmatprep.mubr.f32.mxu0 %v3902_v3  ;;  %v3017_v49 = vld [vmem:[%s3894_s3 + $0x40] sm:$0xff]  ;;  %v3035_v55 = vld [vmem:[%s3894_s3 + $0x10] sm:$0xff] }
  0x24   :  { %401 = vmatprep.subr.mxu0 %v2655_v48  ;;  %2032 = vmatprep.subr.mxu1 %v38_v5  ;;  %3932 = vst [vmem:[#allocation9_spill] sm:$0xff] %v3035_v55 }
  0x25   :  { %402 = vmatpush1.msra.mxu0 %v2665_v50  ;;  %2033 = vmatpush3.msra.mxu1 %v38_v5  ;;  %v81_v5 = vld [vmem:[%s3896_s4] sm:$0x7] }
  0x26   :  { %169 = vmatmul.mubr.f32.gmra.mxu0 %v2672_v51  ;;  %403 = vmatprep.subr.mxu0 %v2677_v52 }
  0x27   :  { %404 = vmatpush1.msra.mxu0 %v2683_v53  ;;  %174 = vmatprep.mubr.f32.mxu0 %v3902_v3 }
  0x28   :  { %405 = vmatprep.subr.mxu0 %v2689_v54  ;;  %2034 = vmatprep.subr.mxu1 %v35_v11 }
  0x29   :  { %406 = vmatpush1.msra.mxu0 %v2699_v56  ;;  %2035 = vmatpush3.msra.mxu1 %v35_v11 }
  0x2a   :  { %175 = vmatmul.mubr.f32.gmra.mxu0 %v2706_v57  ;;  %407 = vmatprep.subr.mxu0 %v2711_v58 }
  0x2b   :  { %408 = vmatpush1.msra.mxu0 %v2717_v59  ;;  %180 = vmatprep.mubr.f32.mxu0 %v3902_v3 }
  0x2c   :  { %409 = vmatprep.subr.mxu0 %v2723_v60  ;;  %2036 = vmatprep.mubr.f32.mxu1 %v2640_v45  ;;  %v3008_v45 = vld [vmem:[%s3894_s3 + $0x58] sm:$0xff] }
  0x2d   :  { %410 = vmatpush1.msra.mxu0 %v2733_v62  ;;  %2048 = vmatprep.subr.mxu1 %v3902_v3 }
  0x2e   :  { %181 = vmatmul.mubr.f32.gmra.mxu0 %v2740_v63  ;;  %411 = vmatprep.subr.mxu0 %v2745_v0 }
  0x2f   :  { %412 = vmatpush1.msra.mxu0 %v2751_v1  ;;  %186 = vmatprep.mubr.f32.mxu0 %v3902_v3 }
  0x30   :  { %413 = vmatprep.subr.mxu0 %v2757_v2  ;;  %2037 = vmatmul.mubr.f32.vlgmr.msra.gmra.mxu1 %v2672_v51  ;;  %v3026_v51 = vld [vmem:[%s3894_s3 + $0x28] sm:$0xff] }
  0x31   :  { %414 = vmatpush1.msra.mxu0 %v2767_v6  ;;  %2049 = vmatpush3.msra.mxu1 %v2867_v23  ;;  %3931 = vst [vmem:[#allocation8_spill] sm:$0xff] %v3026_v51 }
  0x32   :  { %187 = vmatmul.mubr.f32.gmra.mxu0 %v2774_v7  ;;  %415 = vmatprep.subr.mxu0 %v2779_v8 }
  0x33   :  { %416 = vmatpush1.msra.mxu0 %v2785_v9  ;;  %192 = vmatprep.mubr.f32.mxu0 %v3902_v3 }
  0x34   :  { %417 = vmatprep.subr.mxu0 %v2791_v10  ;;  %2050 = vmatprep.subr.mxu1 %v3902_v3 }
  0x35   :  { %418 = vmatpush1.msra.mxu0 %v2801_v12  ;;  %2051 = vmatpush3.msra.mxu1 %v2907_v30 }
  0x36   :  { %193 = vmatmul.mubr.f32.gmra.mxu0 %v2808_v13  ;;  %419 = vmatprep.subr.mxu0 %v2813_v14 }
  0x37   :  { %420 = vmatpush1.msra.mxu0 %v2819_v15  ;;  %198 = vmatprep.mubr.f32.mxu0 %v3902_v3 }
  0x38   :  { %421 = vmatprep.subr.mxu0 %v2825_v16  ;;  %2052 = vmatprep.subr.mxu1 %v3902_v3 }
  0x39   :  { %422 = vmatpush1.msra.mxu0 %v2832_v17  ;;  %2053 = vmatpush3.msra.mxu1 %v2916_v31 }
  0x3a   :  { %199 = vmatmul.mubr.f32.gmra.mxu0 %v31_v18  ;;  %423 = vmatprep.subr.mxu0 %v2842_v19 }
  0x3b   :  { %424 = vmatpush1.msra.mxu0 %v2848_v20  ;;  %204 = vmatprep.mubr.f32.mxu0 %v3902_v3 }
  0x3c   :  { %425 = vmatprep.subr.mxu0 %v2855_v21  ;;  %2039 = vmatprep.mubr.f32.mxu1 %v2706_v57  ;;  %v83_v57 = vlaneseq }
  0x3d   :  { %426 = vmatpush1.msra.mxu0 %v2862_v22  ;;  %2054 = vmatprep.subr.mxu1 %v3902_v3 }
  0x3e   :  { %205 = vmatmul.mubr.f32.gmra.mxu0 %v32_v24  ;;  %427 = vmatprep.subr.mxu0 %v2877_v25  ;;  %v84_v61 = vshrl.u32 %v83_v57, 7 }
  0x3f   :  { %428 = vmatpush1.msra.mxu0 %v2883_v26  ;;  %463 = vmatprep.mubr.f32.mxu0 %v3902_v3 }
  0x40   :  { %429 = vmatprep.subr.mxu0 %v2890_v27  ;;  %2040 = vmatmul.mubr.f32.gmra.mxu1 %v2740_v63  ;;  %v85_v63 = vsub.s32 0, %v84_v61  ;;  %v89_v11 = vsub.s32 1, %v84_v61 }
  0x41   :  { %430 = vmatpush1.msra.mxu0 %v2902_v29  ;;  %2055 = vmatpush3.msra.mxu1 %v2926_v32 }
  0x42   :  { %464 = vmatmul.mubr.f32.vlgmr.msra.gmra.mxu0 %v3902_v3  ;;  %2042 = vmatprep.mubr.f32.mxu1 %v2774_v7 }
  0x43   :  { %2056 = vmatprep.subr.mxu1 %v3902_v3  ;;  %565 = vperm.xlu0 %2331, %v563_v33   ;;  %v90_v33 = vrot.slane %v81_v5, %v89_v11 }
  0x44   :  { %2057 = vmatpush3.msra.mxu1 %v2935_v34  ;;  %574 = vmatprep.subr.mxu0 %v2645_v46 }
  0x45   :  { %2058 = vmatprep.subr.mxu1 %v3902_v3  ;;  %2043 = vmatmul.mubr.f32.gmra.mxu1 %v2808_v13 }
  0x46   :  { %2059 = vmatpush3.msra.mxu1 %v2945_v35  ;;  %2045 = vmatprep.mubr.f32.mxu1 %v31_v18  ;;  %v86_v18 = vrot.slane %v81_v5, %v85_v63 }
  0x47   :  { %2060 = vmatprep.subr.mxu1 %v3902_v3  ;;  %740 = vperm.xlu0 %2331, %v738_v36  }
  0x48   :  { %2061 = vmatpush3.msra.mxu1 %v2954_v37  ;;  %575 = vmatpush1.msra.mxu0 %v2650_v47 }
  0x49   :  { %2062 = vmatprep.subr.mxu1 %v3902_v3  ;;  %2046 = vmatmul.mubr.f32.gmra.mxu1 %v32_v24 }
  0x4a   :  { %2063 = vmatpush3.msra.mxu1 %v2963_v38  ;;  %2080 = vmatprep.mubr.msk.f32.mxu1 %vm2464_vm4, %v3902_v3 }
  0x4b   :  { %2064 = vmatprep.subr.mxu1 %v3902_v3  ;;  %1271 = vperm.xlu0 %2331, %v1269_v39  }
  0x4c   :  { %2065 = vmatpush3.msra.mxu1 %v2972_v40  ;;  %576 = vmatprep.subr.mxu0 %v2655_v48 }
  0x4d   :  { %2066 = vmatprep.subr.mxu1 %v3902_v3  ;;  %577 = vmatpush1.msra.mxu0 %v2665_v50 }
  0x4e   :  { %2067 = vmatpush3.msra.mxu1 %v2982_v41  ;;  %578 = vmatprep.subr.mxu0 %v2677_v52 }
  0x4f   :  { %2068 = vmatprep.subr.mxu1 %v3902_v3  ;;  %1625 = vperm.xlu0 %2331, %v1623_v42  }
  0x50   :  { %2069 = vmatpush3.msra.mxu1 %v2991_v43  ;;  %579 = vmatpush1.msra.mxu0 %v2683_v53 }
  0x51   :  { %2070 = vmatprep.subr.mxu1 %v3902_v3  ;;  %580 = vmatprep.subr.mxu0 %v2689_v54 }
  0x52   :  { %2071 = vmatpush3.msra.mxu1 %v3000_v44  ;;  %581 = vmatpush1.msra.mxu0 %v2699_v56 }
  0x53   :  { %2072 = vmatprep.subr.mxu1 %v3902_v3  ;;  %582 = vmatprep.subr.mxu0 %v2711_v58 }
  0x54   :  { %2073 = vmatpush3.msra.mxu1 %v3008_v45  ;;  %583 = vmatpush1.msra.mxu0 %v2717_v59 }
  0x55   :  { %2074 = vmatprep.subr.mxu1 %v3902_v3  ;;  %584 = vmatprep.subr.mxu0 %v2723_v60 }
  0x56   :  { %2075 = vmatpush3.msra.mxu1 %v3017_v49  ;;  %585 = vmatpush1.msra.mxu0 %v2733_v62 }
  0x57   :  { %2076 = vmatprep.subr.mxu1 %v3902_v3  ;;  %586 = vmatprep.subr.mxu0 %v2745_v0 }
  0x58   :  { %2077 = vmatpush3.msra.mxu1 %v3026_v51  ;;  %587 = vmatpush1.msra.mxu0 %v2751_v1 }
  0x59   :  { %2078 = vmatprep.subr.mxu1 %v3902_v3  ;;  %588 = vmatprep.subr.mxu0 %v2757_v2 }
  0x5a   :  { %2079 = vmatpush3.msra.mxu1 %v3035_v55  ;;  %589 = vmatpush1.msra.mxu0 %v2767_v6 }
  0x5b   :  { %2081 = vmatmul.mubr.f32.vlgmr.msra.gmra.mxu1 %v3902_v3  ;;  %2083 = vmatprep.subr.mxu1 %v3902_v3 }
  0x5c   :  { %2084 = vmatpush3.msra.mxu1 %v2867_v23  ;;  %590 = vmatprep.subr.mxu0 %v2779_v8 }
  0x5d   :  { %2085 = vmatprep.subr.mxu1 %v3902_v3  ;;  %591 = vmatpush1.msra.mxu0 %v2785_v9 }
  0x5e   :  { %2086 = vmatpush3.msra.mxu1 %v2907_v30  ;;  %592 = vmatprep.subr.mxu0 %v2791_v10 }
  0x5f   :  { %2087 = vmatprep.subr.mxu1 %v3902_v3  ;;  %593 = vmatpush1.msra.mxu0 %v2801_v12 }
  0x60   :  { %2088 = vmatpush3.msra.mxu1 %v2916_v31  ;;  %594 = vmatprep.subr.mxu0 %v2813_v14 }
  0x61   :  { %2089 = vmatprep.subr.mxu1 %v3902_v3  ;;  %595 = vmatpush1.msra.mxu0 %v2819_v15 }
  0x62   :  { %2090 = vmatpush3.msra.mxu1 %v2926_v32  ;;  %596 = vmatprep.subr.mxu0 %v2825_v16 }
  0x63   :  { %2091 = vmatprep.subr.mxu1 %v3902_v3  ;;  %597 = vmatpush1.msra.mxu0 %v2832_v17 }
  0x64   :  { %2092 = vmatpush3.msra.mxu1 %v2935_v34  ;;  %598 = vmatprep.subr.mxu0 %v2842_v19 }
  0x65   :  { %2093 = vmatprep.subr.mxu1 %v3902_v3  ;;  %599 = vmatpush1.msra.mxu0 %v2848_v20 }
  0x66   :  { %2094 = vmatpush3.msra.mxu1 %v2945_v35  ;;  %600 = vmatprep.subr.mxu0 %v2855_v21 }
  0x67   :  { %2095 = vmatprep.subr.mxu1 %v3902_v3  ;;  %601 = vmatpush1.msra.mxu0 %v2862_v22 }
  0x68   :  { %2096 = vmatpush3.msra.mxu1 %v2954_v37  ;;  %602 = vmatprep.subr.mxu0 %v2877_v25 }
  0x69   :  { %2097 = vmatprep.subr.mxu1 %v3902_v3  ;;  %603 = vmatpush1.msra.mxu0 %v2883_v26 }
  0x6a   :  { %2098 = vmatpush3.msra.mxu1 %v2963_v38  ;;  %604 = vmatprep.subr.mxu0 %v2890_v27 }
  0x6b   :  { %2099 = vmatprep.subr.mxu1 %v3902_v3  ;;  %605 = vmatpush1.msra.mxu0 %v2902_v29 }
  0x6c   :  { %2100 = vmatpush3.msra.mxu1 %v2972_v40  ;;  %638 = vmatprep.mubr.f32.mxu0 %v3902_v3 }
  0x6d   :  { %2101 = vmatprep.subr.mxu1 %v3902_v3  ;;  %2115 = vmatprep.mubr.msk.f32.mxu1 %vm2464_vm4, %v3902_v3 }
  0x6e   :  { %2102 = vmatpush3.msra.mxu1 %v2982_v41  ;;  %751 = vmatprep.subr.mxu0 %v2645_v46 }
  0x6f   :  { %2103 = vmatprep.subr.mxu1 %v3902_v3 }
  0x70   :  { %2104 = vmatpush3.msra.mxu1 %v2991_v43 }
  0x71   :  { %2105 = vmatprep.subr.mxu1 %v3902_v3 }
  0x72   :  { %2106 = vmatpush3.msra.mxu1 %v3000_v44 }
  0x73   :  { %2107 = vmatprep.subr.mxu1 %v3902_v3 }
  0x74   :  { %2108 = vmatpush3.msra.mxu1 %v3008_v45 }
  0x75   :  { %2109 = vmatprep.subr.mxu1 %v3902_v3 }
  0x76   :  { %2110 = vmatpush3.msra.mxu1 %v3017_v49 }
  0x77   :  { %2111 = vmatprep.subr.mxu1 %v3902_v3 }
  0x78   :  { %2112 = vmatpush3.msra.mxu1 %v3026_v51 }
  0x79   :  { %2113 = vmatprep.subr.mxu1 %v3902_v3 }
  0x7a   :  { %2114 = vmatpush3.msra.mxu1 %v3035_v55 }
  0x7b   :  { %2118 = vmatprep.subr.mxu1 %v3902_v3 }
  0xe2   :  { %v164_v7 = vpop.f32.mrf.mxu0 }
  0xe4   :  { %v166_v13 = vpop.f32.mrf.mxu0 }
  0xe6   :  { %v170_v24 = vpop.f32.mrf.mxu0 }
  0xe7   :  { %v3101_v36 = vadd.f32 %v170_v24, %v86_v18 }
  0xe8   :  { %v172_v39 = vpop.f32.mrf.mxu0 }
  0xe9   :  { %3933 = vst [vmem:[#allocation10_spill] sm:$0xff] %v3101_v36  ;;  %v3103_v42 = vadd.f32 %v172_v39, %v90_v33  ;;  %v93_v39 = vsub.s32 2, %v84_v61 }
  0xea   :  { %v176_v4 = vpop.f32.mrf.mxu0 }
  0xeb   :  { %3934 = vst [vmem:[#allocation11_spill] sm:$0xff] %v3103_v42  ;;  %v3105_v3 = vadd.f32 %v176_v4, %v86_v18 }
  0xec   :  { %v178_v57 = vpop.f32.mrf.mxu0 }
  0xed   :  { %3935 = vst [vmem:[#allocation12_spill] sm:$0xff] %v3105_v3  ;;  %v3107_v28 = vadd.f32 %v178_v57, %v90_v33  ;;  %v94_v57 = vrot.slane %v81_v5, %v93_v39 }
  0xee   :  { %v182_v46 = vpop.f32.mrf.mxu0 }
  0xef   :  { %3936 = vst [vmem:[#allocation13_spill] sm:$0xff] %v3107_v28  ;;  %v3109_v55 = vadd.f32 %v182_v46, %v86_v18 }
  0xf0   :  { %v184_v29 = vpop.f32.mrf.mxu0 }
  0xf1   :  { %3937 = vst [vmem:[#allocation14_spill] sm:$0xff] %v3109_v55  ;;  %v3111_v27 = vadd.f32 %v184_v29, %v90_v33  ;;  %v2038_v29 = vpop.f32.mrf.mxu1 }
  0xf2   :  { %v188_v63 = vpop.f32.mrf.mxu0 }
  0xf3   :  { %3938 = vst [vmem:[#allocation15_spill] sm:$0xff] %v3111_v27  ;;  %v3113_v51 = vadd.f32 %v188_v63, %v86_v18  ;;  %v3125_v63 = vadd.f32 %v2038_v29, %v94_v57 }
  0xf4   :  { %v190_v11 = vpop.f32.mrf.mxu0 }
  0xf5   :  { %3939 = vst [vmem:[#allocation16_spill] sm:$0xff] %v3113_v51  ;;  %v3115_v24 = vadd.f32 %v190_v11, %v90_v33 }
  0xf6   :  { %v194_v42 = vpop.f32.mrf.mxu0 }
  0xf7   :  { %3940 = vst [vmem:[#allocation17_spill] sm:$0xff] %v3115_v24  ;;  %v3117_v36 = vadd.f32 %v194_v42, %v86_v18  ;;  %v165_v24 = vadd.f32 %v164_v7, %v86_v18 }
  0xf8   :  { %v196_v4 = vpop.f32.mrf.mxu0 }
  0xf9   :  { %3941 = vst [vmem:[#allocation18_spill] sm:$0xff] %v3117_v36  ;;  %v3119_v3 = vadd.f32 %v196_v4, %v90_v33  ;;  %v277_v4 = vpop.f32.mrf.mxu1 }
  0xfa   :  { %v200_v28 = vpop.f32.mrf.mxu0 }
  0xfb   :  { %3942 = vst [vmem:[#allocation19_spill] sm:$0xff] %v3119_v3  ;;  %v3121_v46 = vadd.f32 %v200_v28, %v86_v18 }
  0xfc   :  { %v202_v55 = vpop.f32.mrf.mxu0 }
  0xfd   :  { %3943 = vst [vmem:[#allocation20_spill] sm:$0xff] %v3121_v46  ;;  %v3123_v27 = vadd.f32 %v202_v55, %v90_v33  ;;  %v167_v55 = vadd.f32 %v166_v13, %v90_v33 }
  0xfe   :  { %v206_v51 = vpop.f32.mrf.mxu0 }
  0xff   :  { %3944 = vst [vmem:[#allocation21_spill] sm:$0xff] %v3123_v27  ;;  %v3127_v11 = vadd.f32 %v206_v51, %v86_v18 }
 0x100   :  { %v208_v61 = vpop.f32.mrf.mxu0  ;;  %v2041_v5 = vpop.f32.mrf.mxu1 }
 0x101   :  { %3945 = vst [vmem:[#allocation22_spill] sm:$0xff] %v3127_v11  ;;  %v3129_v42 = vadd.f32 %v208_v61, %v90_v33  ;;  %v3131_v28 = vadd.f32 %v2041_v5, %v94_v57 }
 0x102   :  { %v465_v36 = vpop.f32.mrf.mxu0  ;;  %v287_v26 = vpop.f32.mrf.mxu1 }
 0x103   :  { %3946 = vst [vmem:[#allocation23_spill] sm:$0xff] %v3129_v42  ;;  %v540_v3 = vadd.f32 %v465_v36, %v165_v24  ;;  %3947 = vst [vmem:[#allocation24_spill] sm:$0xff] %v3131_v28  ;;  %v3133_v29 = vadd.f32 %v287_v26, %v94_v57 }
 0x104   :  { %v467_v46 = vpop.f32.mrf.mxu0 }
 0x105   :  { %v1819_v39 = vmul.f32 -1.442695, %v540_v3  ;;  %3948 = vst [vmem:[#allocation25_spill] sm:$0xff] %v3133_v29  ;;  %v2044_v27 = vpop.f32.mrf.mxu1  ;;  %v547_v51 = vadd.f32 %v467_v46, %v167_v55  ;;  %v3963_v29 = vld [vmem:[#allocation11_spill] sm:$0xff] }
 0x106   :  { %v3135_v11 = vadd.f32 %v2044_v27, %v94_v57  ;;  %v3146_v27 = vld [vmem:[%s3897_s5] ss:$0 sm:$0xff] }
 0x107   :  { %2333 = vpow2.f32 %v1819_v39  ;;  %v297_v7 = vpop.f32.mrf.mxu1  ;;  %v1820_v42 = vmul.f32 -1.442695, %v547_v51 }
 0x108   :  { %3949 = vst [vmem:[#allocation26_spill] sm:$0xff] %v3135_v11  ;;  %v3137_v18 = vadd.f32 %v297_v7, %v94_v57  ;;  %v278_v7 = vadd.f32 %v277_v4, %v94_v57  ;;  %v3955_v4 = vld [vmem:[#allocation8_spill] sm:$0xff] }
 0x109   :  { %v2047_v61 = vpop.f32.mrf.mxu1  ;;  %2335 = vpow2.f32 %v1820_v42 }
 0x10a   :  { %3950 = vst [vmem:[#allocation27_spill] sm:$0xff] %v3137_v18  ;;  %v3139_v36 = vadd.f32 %v2047_v61, %v94_v57 }
 0x10b   :  { %v307_v3 = vpop.f32.mrf.mxu1 }
 0x10c   :  { %3951 = vst [vmem:[#allocation28_spill] sm:$0xff] %v3139_v36  ;;  %v3141_v24 = vadd.f32 %v307_v3, %v94_v57  ;;  %v566_v36 = vpop.permute.xlu0 %565  ;;  %v3953_v57 = vmov 0.0  }
 0x10d   :  { %vm567_vm5 = vcmp.eq.s32.totalorder %v566_v36, 1  ;;  %v3957_v36 = vld [vmem:[#allocation7_spill] sm:$0xff] }
 0x10e   :  { %3952 = vst [vmem:[#allocation29_spill] sm:$0xff] %v3141_v24 }
 0x114   :  { %v2334_v5 = vpop.eup %2333 }
 0x115   :  { %v544_v13 = vadd.f32 1.0, %v2334_v5 }
 0x116   :  { %v2336_v26 = vpop.eup %2335 }
 0x117   :  { %2337 = vrcp.f32 %v544_v13  ;;  %v551_v39 = vadd.f32 1.0, %v2336_v26  ;;  %v3959_v26 = vld [vmem:[#allocation3_spill] sm:$0xff] }
 0x119   :  { %2339 = vrcp.f32 %v551_v39 }
 0x11b   :  { %v536_v33 = vpop.f32.mrf.mxu1 }
 0x11c   :  { %v554_v55 = vadd.f32 %v3146_v27, %v536_v33  ;;  %v3960_v33 = vld [vmem:[#allocation6_spill] sm:$0xff] }
 0x11d   :  { %v2082_v46 = vpop.f32.mrf.mxu1  ;;  %vm914_vm6 = vcmp.gt.s32.totalorder %v3960_v33, 2  ;;  %vm1091_vm7 = vcmp.gt.s32.totalorder %v3960_v33, 3  ;;  %vm1445_vm8 = vcmp.gt.s32.totalorder %v3960_v33, 5  ;;  %vm1799_vm9 = vcmp.gt.s32.totalorder %v3960_v33, 7 }
 0x11e   :  { %v3961_v46 = vmov 0  }
 0x11f   :  { %v915_v39 = vsel %vm914_vm6, 1, %v3961_v46 }
 0x120   :  { %917 = vperm.xlu1 %2332, %v915_v39  }
 0x124   :  { %v2338_v51 = vpop.eup %2337 }
 0x125   :  { %v555_v61 = vmul.f32 %v2338_v51, %v554_v55  ;;  %v1092_v55 = vsel %vm1091_vm7, 1, %v3961_v46  ;;  %v1446_v51 = vsel %vm1445_vm8, 1, %v3961_v46 }
 0x126   :  { %v2340_v42 = vpop.eup %2339  ;;  %1094 = vperm.xlu1 %2332, %v1092_v55  }
 0x127   :  { %v556_v3 = vadd.f32 %v555_v61, %v278_v7  ;;  %v558_v5 = vsub.f32 1.0, %v2340_v42  ;;  %v560_v11 = vmul.f32 0.0, %v2340_v42  ;;  %v1800_v7 = vsel %vm1799_vm9, 1, %v3961_v46  ;;  %v3962_v42 = vld [vmem:[#allocation10_spill] sm:$0xff] }
 0x129   :  { %2341 = vtanh.f32 %v556_v3 }
 0x12a   :  { %1448 = vperm.xlu1 %2332, %v1446_v51  }
 0x12e   :  { %1802 = vperm.xlu1 %2332, %v1800_v7  }
 0x136   :  { %v2342_v13 = vpop.eup %2341 }
 0x137   :  { %v559_v24 = vmul.f32 %v2342_v13, %v558_v5 }
 0x139   :  { %v561_v18 = vadd.f32 %v560_v11, %v559_v24  ;;  %v3954_v11 = vld [vmem:[#allocation4_spill] sm:$0xff]  ;;  %v3958_v24 = vld [vmem:[#allocation9_spill] sm:$0xff] }
 0x13b   :  { %v3149_v28 = vsel %vm567_vm5, %v561_v18, 0.0  ;;  %1821 = vmatmul.mubr.msk.f32.vlgmr.msra.gmra.mxu0 %vm567_vm5, %v561_v18  ;;  %2116 = vmatmul.mubr.msk.f32.vlgmr.msra.gmra.mxu1 %vm567_vm5, %v561_v18  ;;  %v3956_v18 = vld [vmem:[#allocation5_spill] sm:$0xff] }
 0x13c   :  { %569 = vst [vmem:[%s3898_s6] sm:$0xff] %v3149_v28  ;;  %752 = vmatpush1.msra.mxu0 %v2650_v47  ;;  %2119 = vmatpush3.msra.mxu1 %v2867_v23 }
 0x13d   :  { %753 = vmatprep.subr.mxu0 %v2655_v48  ;;  %2120 = vmatprep.subr.mxu1 %v3953_v57 }
 0x13e   :  { %754 = vmatpush1.msra.mxu0 %v2665_v50  ;;  %2121 = vmatpush3.msra.mxu1 %v2907_v30 }
 0x13f   :  { %755 = vmatprep.subr.mxu0 %v2677_v52  ;;  %2122 = vmatprep.subr.mxu1 %v3953_v57 }
 0x140   :  { %756 = vmatpush1.msra.mxu0 %v2683_v53  ;;  %2123 = vmatpush3.msra.mxu1 %v2916_v31 }
 0x141   :  { %757 = vmatprep.subr.mxu0 %v2689_v54  ;;  %2124 = vmatprep.subr.mxu1 %v3953_v57 }
 0x142   :  { %758 = vmatpush1.msra.mxu0 %v2699_v56  ;;  %2125 = vmatpush3.msra.mxu1 %v2926_v32 }
 0x143   :  { %759 = vmatprep.subr.mxu0 %v2711_v58  ;;  %2126 = vmatprep.subr.mxu1 %v3953_v57 }
 0x144   :  { %760 = vmatpush1.msra.mxu0 %v2717_v59  ;;  %2127 = vmatpush3.msra.mxu1 %v2935_v34 }
 0x145   :  { %761 = vmatprep.subr.mxu0 %v2723_v60  ;;  %2128 = vmatprep.subr.mxu1 %v3953_v57 }
 0x146   :  { %762 = vmatpush1.msra.mxu0 %v2733_v62  ;;  %2129 = vmatpush3.msra.mxu1 %v2945_v35 }
 0x147   :  { %763 = vmatprep.subr.mxu0 %v2745_v0  ;;  %2130 = vmatprep.subr.mxu1 %v3953_v57 }
 0x148   :  { %764 = vmatpush1.msra.mxu0 %v2751_v1  ;;  %2131 = vmatpush3.msra.mxu1 %v2954_v37 }
 0x149   :  { %765 = vmatprep.subr.mxu0 %v2757_v2  ;;  %2132 = vmatprep.subr.mxu1 %v3953_v57 }
 0x14a   :  { %766 = vmatpush1.msra.mxu0 %v2767_v6  ;;  %2133 = vmatpush3.msra.mxu1 %v2963_v38 }
 0x14b   :  { %767 = vmatprep.subr.mxu0 %v2779_v8  ;;  %2134 = vmatprep.subr.mxu1 %v3953_v57 }
 0x14c   :  { %768 = vmatpush1.msra.mxu0 %v2785_v9  ;;  %2135 = vmatpush3.msra.mxu1 %v2972_v40 }
 0x14d   :  { %769 = vmatprep.subr.mxu0 %v2791_v10  ;;  %2136 = vmatprep.subr.mxu1 %v3953_v57 }
 0x14e   :  { %770 = vmatpush1.msra.mxu0 %v2801_v12  ;;  %2137 = vmatpush3.msra.mxu1 %v2982_v41 }
 0x14f   :  { %771 = vmatprep.subr.mxu0 %v2813_v14  ;;  %2138 = vmatprep.subr.mxu1 %v3953_v57 }
 0x150   :  { %772 = vmatpush1.msra.mxu0 %v2819_v15  ;;  %2139 = vmatpush3.msra.mxu1 %v2991_v43 }
 0x151   :  { %773 = vmatprep.subr.mxu0 %v2825_v16  ;;  %2140 = vmatprep.subr.mxu1 %v3953_v57 }
 0x152   :  { %774 = vmatpush1.msra.mxu0 %v2832_v17  ;;  %2141 = vmatpush3.msra.mxu1 %v3000_v44 }
 0x153   :  { %775 = vmatprep.subr.mxu0 %v2842_v19  ;;  %2142 = vmatprep.subr.mxu1 %v3953_v57 }
 0x154   :  { %776 = vmatpush1.msra.mxu0 %v2848_v20  ;;  %2143 = vmatpush3.msra.mxu1 %v3008_v45 }
 0x155   :  { %777 = vmatprep.subr.mxu0 %v2855_v21  ;;  %2144 = vmatprep.subr.mxu1 %v3953_v57 }
 0x156   :  { %778 = vmatpush1.msra.mxu0 %v2862_v22  ;;  %2145 = vmatpush3.msra.mxu1 %v3017_v49 }
 0x157   :  { %779 = vmatprep.subr.mxu0 %v2877_v25  ;;  %2146 = vmatprep.subr.mxu1 %v3953_v57 }
 0x158   :  { %780 = vmatpush1.msra.mxu0 %v3954_v11  ;;  %2147 = vmatpush3.msra.mxu1 %v3955_v4 }
 0x159   :  { %781 = vmatprep.subr.mxu0 %v3956_v18  ;;  %2148 = vmatprep.subr.mxu1 %v3953_v57 }
 0x15a   :  { %782 = vmatpush1.msra.mxu0 %v3957_v36  ;;  %815 = vmatprep.mubr.f32.mxu0 %v3953_v57 }
 0x15b   :  { %2149 = vmatpush3.msra.mxu1 %v3958_v24  ;;  %2150 = vmatprep.mubr.msk.f32.mxu1 %vm2464_vm4, %v3953_v57 }
 0x15c   :  { %928 = vmatprep.subr.mxu0 %v3959_v26  ;;  %2153 = vmatprep.subr.mxu1 %v3953_v57 }
 0x1fb   :  { %v640_v61 = vpop.f32.mrf.mxu0  ;;  %v711_v3 = vpop.f32.mrf.mxu1 }
 0x1fc   :  { %v715_v5 = vadd.f32 %v640_v61, %v3962_v42  ;;  %v729_v46 = vadd.f32 %v3146_v27, %v711_v3 }
 0x1fd   :  { %v2117_v13 = vpop.f32.mrf.mxu1  ;;  %v642_v39 = vpop.f32.mrf.mxu0 }
 0x1fe   :  { %v1823_v26 = vmul.f32 -1.442695, %v715_v5  ;;  %v722_v24 = vadd.f32 %v642_v39, %v3963_v29 }
 0x200   :  { %2343 = vpow2.f32 %v1823_v26  ;;  %v1824_v36 = vmul.f32 -1.442695, %v722_v24 }
 0x202   :  { %2345 = vpow2.f32 %v1824_v36  ;;  %v741_v36 = vpop.permute.xlu0 %740 }
 0x203   :  { %vm742_vm10 = vcmp.eq.s32.totalorder %v741_v36, 1  ;;  %v3443_v36 = vld [vmem:[%s3894_s3 + $0xa8] sm:$0xff] }
 0x20d   :  { %v2344_v55 = vpop.eup %2343 }
 0x20e   :  { %v719_v18 = vadd.f32 1.0, %v2344_v55 }
 0x20f   :  { %v2346_v33 = vpop.eup %2345 }
 0x210   :  { %2347 = vrcp.f32 %v719_v18  ;;  %v726_v51 = vadd.f32 1.0, %v2346_v33 }
 0x212   :  { %2349 = vrcp.f32 %v726_v51  ;;  %v3331_v51 = vld [vmem:[%s3894_s3 + $0x168] sm:$0xff] }
 0x21d   :  { %v2348_v7 = vpop.eup %2347 }
 0x21e   :  { %v730_v4 = vmul.f32 %v2348_v7, %v729_v46  ;;  %v3338_v46 = vld [vmem:[%s3894_s3 + $0x158] sm:$0xff]  ;;  %v3345_v7 = vld [vmem:[%s3894_s3 + $0x150] sm:$0xff] }
 0x21f   :  { %v2350_v42 = vpop.eup %2349 }
 0x220   :  { %v731_v61 = vadd.f32 %v730_v4, %v3125_v63  ;;  %v733_v5 = vsub.f32 1.0, %v2350_v42  ;;  %v735_v29 = vmul.f32 %v2350_v42, %v3149_v28  ;;  %v918_v63 = vpop.permute.xlu1 %917  ;;  %v3373_v42 = vld [vmem:[%s3894_s3 + $0x120] sm:$0xff] }
 0x221   :  { %vm919_vm11 = vcmp.eq.s32.totalorder %v918_v63, 1  ;;  %v3547_v63 = vld [vmem:[%s3894_s3 + $0x178] sm:$0xff] }
 0x222   :  { %2351 = vtanh.f32 %v731_v61  ;;  %v3359_v61 = vld [vmem:[%s3894_s3 + $0x138] sm:$0xff] }
 0x22f   :  { %v2352_v13 = vpop.eup %2351 }
 0x230   :  { %v734_v26 = vmul.f32 %v2352_v13, %v733_v5  ;;  %v3387_v5 = vld [vmem:[%s3894_s3 + $0x108] sm:$0xff]  ;;  %v3401_v13 = vld [vmem:[%s3894_s3 + $0xf0] sm:$0xff] }
 0x232   :  { %v736_v24 = vadd.f32 %v735_v29, %v734_v26  ;;  %v3415_v26 = vld [vmem:[%s3894_s3 + $0xd8] sm:$0xff]  ;;  %v3429_v29 = vld [vmem:[%s3894_s3 + $0xc0] sm:$0xff] }
 0x234   :  { %v743_v18 = vsel %vm742_vm10, %v736_v24, 0.0  ;;  %v3236_v39 = vsel %vm742_vm10, %v736_v24, %v3149_v28  ;;  %v3457_v24 = vld [vmem:[%s3894_s3 + $0x90] sm:$0xff] }
 0x235   :  { %1825 = vst [vmem:[%s3898_s6 + $0x8] sm:$0xff] %v743_v18  ;;  %816 = vmatmul.mubr.f32.vlgmr.msra.gmra.mxu0 %v3236_v39  ;;  %2151 = vmatmul.mubr.f32.vlgmr.msra.gmra.mxu1 %v3236_v39  ;;  %v3471_v18 = vld [vmem:[%s3894_s3 + $0x78] sm:$0xff] }
 0x236   :  { %929 = vmatpush1.msra.mxu0 %v2650_v47  ;;  %2154 = vmatpush3.msra.mxu1 %v2867_v23  ;;  %v3964_v47 = vld [vmem:[#allocation8_spill] sm:$0xff] }
 0x237   :  { %930 = vmatprep.subr.mxu0 %v2655_v48  ;;  %2155 = vmatprep.subr.mxu1 %v3953_v57  ;;  %v3965_v48 = vld [vmem:[#allocation5_spill] sm:$0xff] }
 0x238   :  { %931 = vmatpush1.msra.mxu0 %v2665_v50  ;;  %2156 = vmatpush3.msra.mxu1 %v2907_v30  ;;  %v3966_v50 = vld [vmem:[#allocation7_spill] sm:$0xff] }
 0x239   :  { %932 = vmatprep.subr.mxu0 %v2677_v52  ;;  %2157 = vmatprep.subr.mxu1 %v3953_v57  ;;  %v3967_v52 = vld [vmem:[#allocation9_spill] sm:$0xff] }
 0x23a   :  { %933 = vmatpush1.msra.mxu0 %v2683_v53  ;;  %2158 = vmatpush3.msra.mxu1 %v2916_v31  ;;  %v3311_v53 = vld [vmem:[%s3894_s3 + $0x170] sm:$0xff] }
 0x23b   :  { %934 = vmatprep.subr.mxu0 %v2689_v54  ;;  %2159 = vmatprep.subr.mxu1 %v3953_v57  ;;  %3968 = vst [vmem:[#allocation4_spill] sm:$0xff] %v3311_v53 }
 0x23c   :  { %935 = vmatpush1.msra.mxu0 %v2699_v56  ;;  %2160 = vmatpush3.msra.mxu1 %v2926_v32 }
 0x23d   :  { %936 = vmatprep.subr.mxu0 %v2711_v58  ;;  %2161 = vmatprep.subr.mxu1 %v3953_v57  ;;  %v3969_v58 = vld [vmem:[#allocation12_spill] sm:$0xff] }
 0x23e   :  { %937 = vmatpush1.msra.mxu0 %v2717_v59  ;;  %2162 = vmatpush3.msra.mxu1 %v2935_v34 }
 0x23f   :  { %938 = vmatprep.subr.mxu0 %v2723_v60  ;;  %2163 = vmatprep.subr.mxu1 %v3953_v57 }
 0x240   :  { %939 = vmatpush1.msra.mxu0 %v2733_v62  ;;  %2164 = vmatpush3.msra.mxu1 %v2945_v35 }
 0x241   :  { %940 = vmatprep.subr.mxu0 %v2745_v0  ;;  %2165 = vmatprep.subr.mxu1 %v3953_v57 }
 0x242   :  { %941 = vmatpush1.msra.mxu0 %v2751_v1  ;;  %2166 = vmatpush3.msra.mxu1 %v2954_v37  ;;  %v3970_v1 = vld [vmem:[#allocation13_spill] sm:$0xff] }
 0x243   :  { %942 = vmatprep.subr.mxu0 %v2757_v2  ;;  %2167 = vmatprep.subr.mxu1 %v3953_v57 }
 0x244   :  { %943 = vmatpush1.msra.mxu0 %v2767_v6  ;;  %2168 = vmatpush3.msra.mxu1 %v2963_v38 }
 0x245   :  { %944 = vmatprep.subr.mxu0 %v2779_v8  ;;  %2169 = vmatprep.subr.mxu1 %v3953_v57 }
 0x246   :  { %945 = vmatpush1.msra.mxu0 %v2785_v9  ;;  %2170 = vmatpush3.msra.mxu1 %v2972_v40 }
 0x247   :  { %946 = vmatprep.subr.mxu0 %v2791_v10  ;;  %2171 = vmatprep.subr.mxu1 %v3953_v57 }
 0x248   :  { %947 = vmatpush1.msra.mxu0 %v2801_v12  ;;  %2172 = vmatpush3.msra.mxu1 %v2982_v41 }
 0x249   :  { %948 = vmatprep.subr.mxu0 %v2813_v14  ;;  %2173 = vmatprep.subr.mxu1 %v3953_v57 }
 0x24a   :  { %949 = vmatpush1.msra.mxu0 %v2819_v15  ;;  %2174 = vmatpush3.msra.mxu1 %v2991_v43 }
 0x24b   :  { %950 = vmatprep.subr.mxu0 %v2825_v16  ;;  %2175 = vmatprep.subr.mxu1 %v3953_v57 }
 0x24c   :  { %951 = vmatpush1.msra.mxu0 %v2832_v17  ;;  %2176 = vmatpush3.msra.mxu1 %v3000_v44  ;;  %v3971_v17 = vld [vmem:[#allocation25_spill] sm:$0xff] }
 0x24d   :  { %952 = vmatprep.subr.mxu0 %v2842_v19  ;;  %2177 = vmatprep.subr.mxu1 %v3953_v57 }
 0x24e   :  { %953 = vmatpush1.msra.mxu0 %v2848_v20  ;;  %2178 = vmatpush3.msra.mxu1 %v3008_v45 }
 0x24f   :  { %954 = vmatprep.subr.mxu0 %v2855_v21  ;;  %2179 = vmatprep.subr.mxu1 %v3953_v57 }
 0x250   :  { %955 = vmatpush1.msra.mxu0 %v2862_v22  ;;  %2180 = vmatpush3.msra.mxu1 %v3017_v49 }
 0x251   :  { %956 = vmatprep.subr.mxu0 %v2877_v25  ;;  %2181 = vmatprep.subr.mxu1 %v3953_v57 }
 0x252   :  { %957 = vmatpush1.msra.mxu0 %v3954_v11  ;;  %2182 = vmatpush3.msra.mxu1 %v3964_v47 }
 0x253   :  { %958 = vmatprep.subr.mxu0 %v3965_v48  ;;  %2183 = vmatprep.subr.mxu1 %v3953_v57 }
 0x254   :  { %959 = vmatpush1.msra.mxu0 %v3966_v50  ;;  %992 = vmatprep.mubr.f32.mxu0 %v3953_v57 }
 0x255   :  { %2184 = vmatpush3.msra.mxu1 %v3967_v52  ;;  %2185 = vmatprep.mubr.msk.f32.mxu1 %vm2464_vm4, %v3953_v57 }
 0x256   :  { %1105 = vmatprep.subr.mxu0 %v3311_v53  ;;  %2188 = vmatprep.subr.mxu1 %v3953_v57 }
 0x2f5   :  { %v817_v54 = vpop.f32.mrf.mxu0  ;;  %v888_v56 = vpop.f32.mrf.mxu1 }
 0x2f6   :  { %v892_v59 = vadd.f32 %v817_v54, %v3969_v58  ;;  %v906_v14 = vadd.f32 %v3146_v27, %v888_v56  ;;  %v3499_v54 = vld [vmem:[%s3894_s3 + $0x48] sm:$0xff]  ;;  %v3513_v56 = vld [vmem:[%s3894_s3 + $0x30] sm:$0xff] }
 0x2f7   :  { %v2152_v60 = vpop.f32.mrf.mxu1  ;;  %v819_v0 = vpop.f32.mrf.mxu0 }
 0x2f8   :  { %v1826_v62 = vmul.f32 -1.442695, %v892_v59  ;;  %v899_v2 = vadd.f32 %v819_v0, %v3970_v1 }
 0x2fa   :  { %2353 = vpow2.f32 %v1826_v62  ;;  %v1827_v6 = vmul.f32 -1.442695, %v899_v2 }
 0x2fc   :  { %2355 = vpow2.f32 %v1827_v6 }
 0x307   :  { %v2354_v8 = vpop.eup %2353 }
 0x308   :  { %v896_v9 = vadd.f32 1.0, %v2354_v8 }
 0x309   :  { %v2356_v10 = vpop.eup %2355 }
 0x30a   :  { %2357 = vrcp.f32 %v896_v9  ;;  %v903_v12 = vadd.f32 1.0, %v2356_v10  ;;  %v3974_v9 = vld [vmem:[#allocation24_spill] sm:$0xff] }
 0x30c   :  { %2359 = vrcp.f32 %v903_v12 }
 0x317   :  { %v2358_v15 = vpop.eup %2357 }
 0x318   :  { %v907_v16 = vmul.f32 %v2358_v15, %v906_v14 }
 0x319   :  { %v2360_v20 = vpop.eup %2359 }
 0x31a   :  { %v908_v19 = vadd.f32 %v907_v16, %v3971_v17  ;;  %v910_v21 = vsub.f32 1.0, %v2360_v20  ;;  %v912_v4 = vmul.f32 %v2360_v20, %v3236_v39 }
 0x31c   :  { %2361 = vtanh.f32 %v908_v19  ;;  %v1095_v19 = vpop.permute.xlu1 %1094 }
 0x31d   :  { %vm1096_vm12 = vcmp.eq.s32.totalorder %v1095_v19, 1 }
 0x329   :  { %v2362_v22 = vpop.eup %2361 }
 0x32a   :  { %v911_v28 = vmul.f32 %v2362_v22, %v910_v21 }
 0x32c   :  { %v913_v3 = vadd.f32 %v912_v4, %v911_v28  ;;  %v3556_v28 = vld [vmem:[%s3894_s3 + $0x160] sm:$0xff]  ;;  %v3565_v4 = vld [vmem:[%s3894_s3 + $0x148] sm:$0xff] }
 0x32e   :  { %v920_v55 = vsel %vm919_vm11, %v913_v3, 0.0  ;;  %v3321_v33 = vsel %vm919_vm11, %v913_v3, %v3236_v39  ;;  %v3485_v39 = vld [vmem:[%s3894_s3 + $0x60] sm:$0xff]  ;;  %v3574_v3 = vld [vmem:[%s3894_s3 + $0x130] sm:$0xff] }
 0x32f   :  { %1828 = vst [vmem:[%s3898_s6 + $0x10] sm:$0xff] %v920_v55  ;;  %993 = vmatmul.mubr.f32.vlgmr.msra.gmra.mxu0 %v3321_v33  ;;  %2186 = vmatmul.mubr.f32.vlgmr.msra.gmra.mxu1 %v3321_v33  ;;  %v3583_v55 = vld [vmem:[%s3894_s3 + $0x118] sm:$0xff] }
 0x330   :  { %1106 = vmatpush1.msra.mxu0 %v3331_v51  ;;  %2189 = vmatpush3.msra.mxu1 %v2867_v23  ;;  %v3352_v23 = vld [vmem:[%s3894_s3 + $0x140] sm:$0xff] }
 0x331   :  { %1107 = vmatprep.subr.mxu0 %v3338_v46  ;;  %2190 = vmatprep.subr.mxu1 %v3953_v57 }
 0x332   :  { %1108 = vmatpush1.msra.mxu0 %v3345_v7  ;;  %2191 = vmatpush3.msra.mxu1 %v2907_v30  ;;  %v3366_v30 = vld [vmem:[%s3894_s3 + $0x128] sm:$0xff] }
 0x333   :  { %1109 = vmatprep.subr.mxu0 %v3352_v23  ;;  %2192 = vmatprep.subr.mxu1 %v3953_v57 }
 0x334   :  { %1110 = vmatpush1.msra.mxu0 %v3359_v61  ;;  %2193 = vmatpush3.msra.mxu1 %v2916_v31  ;;  %v3380_v31 = vld [vmem:[%s3894_s3 + $0x110] sm:$0xff] }
 0x335   :  { %1111 = vmatprep.subr.mxu0 %v3366_v30  ;;  %2194 = vmatprep.subr.mxu1 %v3953_v57 }
 0x336   :  { %1112 = vmatpush1.msra.mxu0 %v3373_v42  ;;  %2195 = vmatpush3.msra.mxu1 %v2926_v32  ;;  %v3394_v32 = vld [vmem:[%s3894_s3 + $0xf8] sm:$0xff] }
 0x337   :  { %1113 = vmatprep.subr.mxu0 %v3380_v31  ;;  %2196 = vmatprep.subr.mxu1 %v3953_v57 }
 0x338   :  { %1114 = vmatpush1.msra.mxu0 %v3387_v5  ;;  %2197 = vmatpush3.msra.mxu1 %v2935_v34  ;;  %v3408_v34 = vld [vmem:[%s3894_s3 + $0xe0] sm:$0xff] }
 0x339   :  { %1115 = vmatprep.subr.mxu0 %v3394_v32  ;;  %2198 = vmatprep.subr.mxu1 %v3953_v57 }
 0x33a   :  { %1116 = vmatpush1.msra.mxu0 %v3401_v13  ;;  %2199 = vmatpush3.msra.mxu1 %v2945_v35  ;;  %v3422_v35 = vld [vmem:[%s3894_s3 + $0xc8] sm:$0xff] }
 0x33b   :  { %1117 = vmatprep.subr.mxu0 %v3408_v34  ;;  %2200 = vmatprep.subr.mxu1 %v3953_v57 }
 0x33c   :  { %1118 = vmatpush1.msra.mxu0 %v3415_v26  ;;  %2201 = vmatpush3.msra.mxu1 %v2954_v37  ;;  %v3436_v37 = vld [vmem:[%s3894_s3 + $0xb0] sm:$0xff] }
 0x33d   :  { %1119 = vmatprep.subr.mxu0 %v3422_v35  ;;  %2202 = vmatprep.subr.mxu1 %v3953_v57 }
 0x33e   :  { %1120 = vmatpush1.msra.mxu0 %v3429_v29  ;;  %2203 = vmatpush3.msra.mxu1 %v2963_v38  ;;  %v3450_v38 = vld [vmem:[%s3894_s3 + $0x98] sm:$0xff] }
 0x33f   :  { %1121 = vmatprep.subr.mxu0 %v3436_v37  ;;  %2204 = vmatprep.subr.mxu1 %v3953_v57 }
 0x340   :  { %1122 = vmatpush1.msra.mxu0 %v3443_v36  ;;  %2205 = vmatpush3.msra.mxu1 %v2972_v40  ;;  %v3464_v40 = vld [vmem:[%s3894_s3 + $0x80] sm:$0xff] }
 0x341   :  { %1123 = vmatprep.subr.mxu0 %v3450_v38  ;;  %2206 = vmatprep.subr.mxu1 %v3953_v57 }
 0x342   :  { %1124 = vmatpush1.msra.mxu0 %v3457_v24  ;;  %2207 = vmatpush3.msra.mxu1 %v2982_v41  ;;  %v3478_v41 = vld [vmem:[%s3894_s3 + $0x68] sm:$0xff] }
 0x343   :  { %1125 = vmatprep.subr.mxu0 %v3464_v40  ;;  %2208 = vmatprep.subr.mxu1 %v3953_v57 }
 0x344   :  { %1126 = vmatpush1.msra.mxu0 %v3471_v18  ;;  %2209 = vmatpush3.msra.mxu1 %v2991_v43  ;;  %v3492_v43 = vld [vmem:[%s3894_s3 + $0x50] sm:$0xff] }
 0x345   :  { %1127 = vmatprep.subr.mxu0 %v3478_v41  ;;  %2210 = vmatprep.subr.mxu1 %v3953_v57 }
 0x346   :  { %1128 = vmatpush1.msra.mxu0 %v3485_v39  ;;  %2211 = vmatpush3.msra.mxu1 %v3000_v44  ;;  %v3506_v44 = vld [vmem:[%s3894_s3 + $0x38] sm:$0xff] }
 0x347   :  { %1129 = vmatprep.subr.mxu0 %v3492_v43  ;;  %2212 = vmatprep.subr.mxu1 %v3953_v57 }
 0x348   :  { %1130 = vmatpush1.msra.mxu0 %v3499_v54  ;;  %2213 = vmatpush3.msra.mxu1 %v3008_v45 }
 0x349   :  { %1131 = vmatprep.subr.mxu0 %v3506_v44  ;;  %2214 = vmatprep.subr.mxu1 %v3953_v57 }
 0x34a   :  { %1132 = vmatpush1.msra.mxu0 %v3513_v56  ;;  %2215 = vmatpush3.msra.mxu1 %v3017_v49  ;;  %v3972_v49 = vld [vmem:[#allocation14_spill] sm:$0xff] }
 0x34b   :  { %1133 = vmatprep.subr.mxu0 %v2877_v25  ;;  %2216 = vmatprep.subr.mxu1 %v3953_v57 }
 0x34c   :  { %1134 = vmatpush1.msra.mxu0 %v3954_v11  ;;  %2217 = vmatpush3.msra.mxu1 %v3964_v47 }
 0x34d   :  { %1135 = vmatprep.subr.mxu0 %v3965_v48  ;;  %2218 = vmatprep.subr.mxu1 %v3953_v57 }
 0x34e   :  { %1136 = vmatpush1.msra.mxu0 %v3966_v50  ;;  %1169 = vmatprep.mubr.f32.mxu0 %v3953_v57  ;;  %v3973_v50 = vld [vmem:[#allocation15_spill] sm:$0xff] }
 0x34f   :  { %2219 = vmatpush3.msra.mxu1 %v3967_v52  ;;  %2220 = vmatprep.mubr.msk.f32.mxu1 %vm2464_vm4, %v3953_v57 }
 0x350   :  { %1282 = vmatprep.subr.mxu0 %v3311_v53  ;;  %2223 = vmatprep.subr.mxu1 %v3953_v57 }
 0x3ef   :  { %v994_v25 = vpop.f32.mrf.mxu0  ;;  %v1065_v45 = vpop.f32.mrf.mxu1 }
 0x3f0   :  { %v1069_v11 = vadd.f32 %v994_v25, %v3972_v49  ;;  %v1083_v2 = vadd.f32 %v3146_v27, %v1065_v45  ;;  %v3601_v25 = vld [vmem:[%s3894_s3 + $0xe8] sm:$0xff]  ;;  %v3610_v45 = vld [vmem:[%s3894_s3 + $0xd0] sm:$0xff]  ;;  %v3619_v49 = vld [vmem:[%s3894_s3 + $0xb8] sm:$0xff] }
 0x3f1   :  { %v2187_v47 = vpop.f32.mrf.mxu1  ;;  %v996_v58 = vpop.f32.mrf.mxu0 }
 0x3f2   :  { %v1829_v48 = vmul.f32 -1.442695, %v1069_v11  ;;  %v1076_v59 = vadd.f32 %v996_v58, %v3973_v50  ;;  %v3628_v11 = vld [vmem:[%s3894_s3 + $0xa0] sm:$0xff]  ;;  %v3637_v47 = vld [vmem:[%s3894_s3 + $0x88] sm:$0xff]  ;;  %v3655_v58 = vld [vmem:[%s3894_s3 + $0x58] sm:$0xff] }
 0x3f3   :  { %v3664_v50 = vld [vmem:[%s3894_s3 + $0x40] sm:$0xff] }
 0x3f4   :  { %2363 = vpow2.f32 %v1829_v48  ;;  %v1830_v60 = vmul.f32 -1.442695, %v1076_v59  ;;  %v3646_v48 = vld [vmem:[%s3894_s3 + $0x70] sm:$0xff]  ;;  %v3670_v59 = vld [vmem:[%s3894_s3 + $0x20] sm:$0xff] }
 0x3f6   :  { %2365 = vpow2.f32 %v1830_v60  ;;  %v3677_v60 = vld [vmem:[%s3894_s3 + $0x18] sm:$0xff] }
 0x401   :  { %v2364_v52 = vpop.eup %2363 }
 0x402   :  { %v1073_v62 = vadd.f32 1.0, %v2364_v52  ;;  %v3683_v52 = vld [vmem:[%s3894_s3 + $0x28] sm:$0xff] }
 0x403   :  { %v2366_v0 = vpop.eup %2365  ;;  %3975 = vst [vmem:[#allocation3_spill] sm:$0xff] %v3683_v52 }
 0x404   :  { %2367 = vrcp.f32 %v1073_v62  ;;  %v1080_v1 = vadd.f32 1.0, %v2366_v0  ;;  %v3689_v62 = vld [vmem:[%s3894_s3 + $0x8] sm:$0xff]  ;;  %v3696_v0 = vld [vmem:[%s3894_s3] sm:$0xff] }
 0x405   :  { %3976 = vst [vmem:[#allocation6_spill] sm:$0xff] %v3689_v62  ;;  %3977 = vst [vmem:[#allocation10_spill] sm:$0xff] %v3696_v0 }
 0x406   :  { %2369 = vrcp.f32 %v1080_v1  ;;  %v3703_v1 = vld [vmem:[%s3894_s3 + $0x10] sm:$0xff] }
 0x407   :  { %3978 = vst [vmem:[#allocation11_spill] sm:$0xff] %v3703_v1 }
 0x411   :  { %v2368_v6 = vpop.eup %2367 }
 0x412   :  { %v1084_v8 = vmul.f32 %v2368_v6, %v1083_v2 }
 0x413   :  { %v2370_v12 = vpop.eup %2369 }
 0x414   :  { %v1085_v10 = vadd.f32 %v1084_v8, %v3974_v9  ;;  %v1087_v14 = vsub.f32 1.0, %v2370_v12  ;;  %v1089_v17 = vmul.f32 %v2370_v12, %v3321_v33  ;;  %v3979_v8 = vld [vmem:[#allocation16_spill] sm:$0xff] }
 0x416   :  { %2371 = vtanh.f32 %v1085_v10 }
 0x423   :  { %v2372_v15 = vpop.eup %2371 }
 0x424   :  { %v1088_v16 = vmul.f32 %v2372_v15, %v1087_v14  ;;  %v3980_v15 = vld [vmem:[#allocation17_spill] sm:$0xff] }
 0x426   :  { %v1090_v20 = vadd.f32 %v1089_v17, %v1088_v16 }
 0x428   :  { %v1097_v21 = vsel %vm1096_vm12, %v1090_v20, 0.0  ;;  %v3536_v22 = vsel %vm1096_vm12, %v1090_v20, %v3321_v33  ;;  %v3592_v33 = vld [vmem:[%s3894_s3 + $0x100] sm:$0xff] }
 0x429   :  { %1831 = vst [vmem:[%s3898_s6 + $0x18] sm:$0xff] %v1097_v21  ;;  %1170 = vmatmul.mubr.f32.vlgmr.msra.gmra.mxu0 %v3536_v22  ;;  %2221 = vmatmul.mubr.f32.vlgmr.msra.gmra.mxu1 %v3536_v22 }
 0x42a   :  { %1283 = vmatpush1.msra.mxu0 %v3331_v51  ;;  %2224 = vmatpush3.msra.mxu1 %v3547_v63 }
 0x42b   :  { %1284 = vmatprep.subr.mxu0 %v3338_v46  ;;  %2225 = vmatprep.subr.mxu1 %v3953_v57 }
 0x42c   :  { %1285 = vmatpush1.msra.mxu0 %v3345_v7  ;;  %2226 = vmatpush3.msra.mxu1 %v3556_v28 }
 0x42d   :  { %1286 = vmatprep.subr.mxu0 %v3352_v23  ;;  %2227 = vmatprep.subr.mxu1 %v3953_v57 }
 0x42e   :  { %1287 = vmatpush1.msra.mxu0 %v3359_v61  ;;  %2228 = vmatpush3.msra.mxu1 %v3565_v4 }
 0x42f   :  { %1288 = vmatprep.subr.mxu0 %v3366_v30  ;;  %2229 = vmatprep.subr.mxu1 %v3953_v57 }
 0x430   :  { %1289 = vmatpush1.msra.mxu0 %v3373_v42  ;;  %2230 = vmatpush3.msra.mxu1 %v3574_v3 }
 0x431   :  { %1290 = vmatprep.subr.mxu0 %v3380_v31  ;;  %2231 = vmatprep.subr.mxu1 %v3953_v57 }
 0x432   :  { %1291 = vmatpush1.msra.mxu0 %v3387_v5  ;;  %2232 = vmatpush3.msra.mxu1 %v3583_v55 }
 0x433   :  { %1292 = vmatprep.subr.mxu0 %v3394_v32  ;;  %2233 = vmatprep.subr.mxu1 %v3953_v57 }
 0x434   :  { %1293 = vmatpush1.msra.mxu0 %v3401_v13  ;;  %2234 = vmatpush3.msra.mxu1 %v3592_v33 }
 0x435   :  { %1294 = vmatprep.subr.mxu0 %v3408_v34  ;;  %2235 = vmatprep.subr.mxu1 %v3953_v57 }
 0x436   :  { %1295 = vmatpush1.msra.mxu0 %v3415_v26  ;;  %2236 = vmatpush3.msra.mxu1 %v3601_v25 }
 0x437   :  { %1296 = vmatprep.subr.mxu0 %v3422_v35  ;;  %2237 = vmatprep.subr.mxu1 %v3953_v57 }
 0x438   :  { %1297 = vmatpush1.msra.mxu0 %v3429_v29  ;;  %2238 = vmatpush3.msra.mxu1 %v3610_v45 }
 0x439   :  { %1298 = vmatprep.subr.mxu0 %v3436_v37  ;;  %2239 = vmatprep.subr.mxu1 %v3953_v57 }
 0x43a   :  { %1299 = vmatpush1.msra.mxu0 %v3443_v36  ;;  %2240 = vmatpush3.msra.mxu1 %v3619_v49 }
 0x43b   :  { %1300 = vmatprep.subr.mxu0 %v3450_v38  ;;  %2241 = vmatprep.subr.mxu1 %v3953_v57 }
 0x43c   :  { %1301 = vmatpush1.msra.mxu0 %v3457_v24  ;;  %2242 = vmatpush3.msra.mxu1 %v3628_v11 }
 0x43d   :  { %1302 = vmatprep.subr.mxu0 %v3464_v40  ;;  %2243 = vmatprep.subr.mxu1 %v3953_v57 }
 0x43e   :  { %1303 = vmatpush1.msra.mxu0 %v3471_v18  ;;  %2244 = vmatpush3.msra.mxu1 %v3637_v47 }
 0x43f   :  { %1304 = vmatprep.subr.mxu0 %v3478_v41  ;;  %2245 = vmatprep.subr.mxu1 %v3953_v57 }
 0x440   :  { %1305 = vmatpush1.msra.mxu0 %v3485_v39  ;;  %2246 = vmatpush3.msra.mxu1 %v3646_v48 }
 0x441   :  { %1306 = vmatprep.subr.mxu0 %v3492_v43  ;;  %2247 = vmatprep.subr.mxu1 %v3953_v57 }
 0x442   :  { %1307 = vmatpush1.msra.mxu0 %v3499_v54  ;;  %2248 = vmatpush3.msra.mxu1 %v3655_v58 }
 0x443   :  { %1308 = vmatprep.subr.mxu0 %v3506_v44  ;;  %2249 = vmatprep.subr.mxu1 %v3953_v57 }
 0x444   :  { %1309 = vmatpush1.msra.mxu0 %v3513_v56  ;;  %2250 = vmatpush3.msra.mxu1 %v3664_v50 }
 0x445   :  { %1310 = vmatprep.subr.mxu0 %v3670_v59  ;;  %2251 = vmatprep.subr.mxu1 %v3953_v57 }
 0x446   :  { %1311 = vmatpush1.msra.mxu0 %v3677_v60  ;;  %2252 = vmatpush3.msra.mxu1 %v3683_v52  ;;  %v3981_v52 = vld [vmem:[#allocation27_spill] sm:$0xff] }
 0x447   :  { %1312 = vmatprep.subr.mxu0 %v3689_v62  ;;  %2253 = vmatprep.subr.mxu1 %v3953_v57 }
 0x448   :  { %1313 = vmatpush1.msra.mxu0 %v3696_v0  ;;  %1346 = vmatprep.mubr.f32.mxu0 %v3953_v57 }
 0x449   :  { %2254 = vmatpush3.msra.mxu1 %v3703_v1  ;;  %2255 = vmatprep.mubr.msk.f32.mxu1 %vm2464_vm4, %v3953_v57 }
 0x44a   :  { %1459 = vmatprep.subr.mxu0 %v3311_v53  ;;  %2258 = vmatprep.subr.mxu1 %v3953_v57 }
 0x4e9   :  { %v1171_v2 = vpop.f32.mrf.mxu0  ;;  %v1242_v6 = vpop.f32.mrf.mxu1 }
 0x4ea   :  { %v1246_v9 = vadd.f32 %v1171_v2, %v3979_v8  ;;  %v1260_v53 = vadd.f32 %v3146_v27, %v1242_v6  ;;  %v3982_v27 = vld [vmem:[#allocation3_spill] sm:$0xff]  ;;  %v3987_v6 = vld [vmem:[#allocation18_spill] sm:$0xff] }
 0x4eb   :  { %v2222_v10 = vpop.f32.mrf.mxu1  ;;  %v1173_v14 = vpop.f32.mrf.mxu0 }
 0x4ec   :  { %v1832_v12 = vmul.f32 -1.442695, %v1246_v9  ;;  %v1253_v16 = vadd.f32 %v1173_v14, %v3980_v15  ;;  %v1272_v15 = vpop.permute.xlu0 %1271 }
 0x4ed   :  { %vm1273_vm13 = vcmp.eq.s32.totalorder %v1272_v15, 1 }
 0x4ee   :  { %2373 = vpow2.f32 %v1832_v12  ;;  %v1833_v17 = vmul.f32 -1.442695, %v1253_v16 }
 0x4f0   :  { %2375 = vpow2.f32 %v1833_v17 }
 0x4fb   :  { %v2374_v19 = vpop.eup %2373 }
 0x4fc   :  { %v1250_v20 = vadd.f32 1.0, %v2374_v19 }
 0x4fd   :  { %v2376_v21 = vpop.eup %2375 }
 0x4fe   :  { %2377 = vrcp.f32 %v1250_v20  ;;  %v1257_v1 = vadd.f32 1.0, %v2376_v21 }
 0x500   :  { %2379 = vrcp.f32 %v1257_v1 }
 0x50b   :  { %v2378_v0 = vpop.eup %2377 }
 0x50c   :  { %v1261_v62 = vmul.f32 %v2378_v0, %v1260_v53  ;;  %v3983_v53 = vld [vmem:[#allocation6_spill] sm:$0xff] }
 0x50d   :  { %v2380_v8 = vpop.eup %2379 }
 0x50e   :  { %v1262_v2 = vadd.f32 %v1261_v62, %v3981_v52  ;;  %v1264_v9 = vsub.f32 1.0, %v2380_v8  ;;  %v1266_v14 = vmul.f32 %v2380_v8, %v3536_v22  ;;  %v3985_v52 = vld [vmem:[#allocation11_spill] sm:$0xff]  ;;  %v3986_v62 = vld [vmem:[#allocation4_spill] sm:$0xff] }
 0x510   :  { %2381 = vtanh.f32 %v1262_v2 }
 0x51d   :  { %v2382_v10 = vpop.eup %2381 }
 0x51e   :  { %v1265_v12 = vmul.f32 %v2382_v10, %v1264_v9  ;;  %v3988_v9 = vld [vmem:[#allocation19_spill] sm:$0xff] }
 0x520   :  { %v1267_v16 = vadd.f32 %v1266_v14, %v1265_v12 }
 0x522   :  { %v1274_v17 = vsel %vm1273_vm13, %v1267_v16, 0.0  ;;  %v3716_v19 = vsel %vm1273_vm13, %v1267_v16, %v3536_v22  ;;  %v3984_v22 = vld [vmem:[#allocation10_spill] sm:$0xff] }
 0x523   :  { %1834 = vst [vmem:[%s3898_s6 + $0x20] sm:$0xff] %v1274_v17  ;;  %1347 = vmatmul.mubr.f32.vlgmr.msra.gmra.mxu0 %v3716_v19  ;;  %2256 = vmatmul.mubr.f32.vlgmr.msra.gmra.mxu1 %v3716_v19 }
 0x524   :  { %1460 = vmatpush1.msra.mxu0 %v3331_v51  ;;  %2259 = vmatpush3.msra.mxu1 %v3547_v63 }
 0x525   :  { %1461 = vmatprep.subr.mxu0 %v3338_v46  ;;  %2260 = vmatprep.subr.mxu1 %v3953_v57 }
 0x526   :  { %1462 = vmatpush1.msra.mxu0 %v3345_v7  ;;  %2261 = vmatpush3.msra.mxu1 %v3556_v28 }
 0x527   :  { %1463 = vmatprep.subr.mxu0 %v3352_v23  ;;  %2262 = vmatprep.subr.mxu1 %v3953_v57 }
 0x528   :  { %1464 = vmatpush1.msra.mxu0 %v3359_v61  ;;  %2263 = vmatpush3.msra.mxu1 %v3565_v4 }
 0x529   :  { %1465 = vmatprep.subr.mxu0 %v3366_v30  ;;  %2264 = vmatprep.subr.mxu1 %v3953_v57 }
 0x52a   :  { %1466 = vmatpush1.msra.mxu0 %v3373_v42  ;;  %2265 = vmatpush3.msra.mxu1 %v3574_v3 }
 0x52b   :  { %1467 = vmatprep.subr.mxu0 %v3380_v31  ;;  %2266 = vmatprep.subr.mxu1 %v3953_v57 }
 0x52c   :  { %1468 = vmatpush1.msra.mxu0 %v3387_v5  ;;  %2267 = vmatpush3.msra.mxu1 %v3583_v55 }
 0x52d   :  { %1469 = vmatprep.subr.mxu0 %v3394_v32  ;;  %2268 = vmatprep.subr.mxu1 %v3953_v57 }
 0x52e   :  { %1470 = vmatpush1.msra.mxu0 %v3401_v13  ;;  %2269 = vmatpush3.msra.mxu1 %v3592_v33 }
 0x52f   :  { %1471 = vmatprep.subr.mxu0 %v3408_v34  ;;  %2270 = vmatprep.subr.mxu1 %v3953_v57 }
 0x530   :  { %1472 = vmatpush1.msra.mxu0 %v3415_v26  ;;  %2271 = vmatpush3.msra.mxu1 %v3601_v25 }
 0x531   :  { %1473 = vmatprep.subr.mxu0 %v3422_v35  ;;  %2272 = vmatprep.subr.mxu1 %v3953_v57 }
 0x532   :  { %1474 = vmatpush1.msra.mxu0 %v3429_v29  ;;  %2273 = vmatpush3.msra.mxu1 %v3610_v45 }
 0x533   :  { %1475 = vmatprep.subr.mxu0 %v3436_v37  ;;  %2274 = vmatprep.subr.mxu1 %v3953_v57 }
 0x534   :  { %1476 = vmatpush1.msra.mxu0 %v3443_v36  ;;  %2275 = vmatpush3.msra.mxu1 %v3619_v49 }
 0x535   :  { %1477 = vmatprep.subr.mxu0 %v3450_v38  ;;  %2276 = vmatprep.subr.mxu1 %v3953_v57 }
 0x536   :  { %1478 = vmatpush1.msra.mxu0 %v3457_v24  ;;  %2277 = vmatpush3.msra.mxu1 %v3628_v11 }
 0x537   :  { %1479 = vmatprep.subr.mxu0 %v3464_v40  ;;  %2278 = vmatprep.subr.mxu1 %v3953_v57 }
 0x538   :  { %1480 = vmatpush1.msra.mxu0 %v3471_v18  ;;  %2279 = vmatpush3.msra.mxu1 %v3637_v47 }
 0x539   :  { %1481 = vmatprep.subr.mxu0 %v3478_v41  ;;  %2280 = vmatprep.subr.mxu1 %v3953_v57 }
 0x53a   :  { %1482 = vmatpush1.msra.mxu0 %v3485_v39  ;;  %2281 = vmatpush3.msra.mxu1 %v3646_v48 }
 0x53b   :  { %1483 = vmatprep.subr.mxu0 %v3492_v43  ;;  %2282 = vmatprep.subr.mxu1 %v3953_v57 }
 0x53c   :  { %1484 = vmatpush1.msra.mxu0 %v3499_v54  ;;  %2283 = vmatpush3.msra.mxu1 %v3655_v58 }
 0x53d   :  { %1485 = vmatprep.subr.mxu0 %v3506_v44  ;;  %2284 = vmatprep.subr.mxu1 %v3953_v57 }
 0x53e   :  { %1486 = vmatpush1.msra.mxu0 %v3513_v56  ;;  %2285 = vmatpush3.msra.mxu1 %v3664_v50 }
 0x53f   :  { %1487 = vmatprep.subr.mxu0 %v3670_v59  ;;  %2286 = vmatprep.subr.mxu1 %v3953_v57 }
 0x540   :  { %1488 = vmatpush1.msra.mxu0 %v3677_v60  ;;  %2287 = vmatpush3.msra.mxu1 %v3982_v27 }
 0x541   :  { %1489 = vmatprep.subr.mxu0 %v3983_v53  ;;  %2288 = vmatprep.subr.mxu1 %v3953_v57 }
 0x542   :  { %1490 = vmatpush1.msra.mxu0 %v3984_v22  ;;  %1523 = vmatprep.mubr.f32.mxu0 %v3953_v57 }
 0x543   :  { %2289 = vmatpush3.msra.mxu1 %v3985_v52  ;;  %2290 = vmatprep.mubr.msk.f32.mxu1 %vm2464_vm4, %v3953_v57 }
 0x544   :  { %1636 = vmatprep.subr.mxu0 %v3986_v62  ;;  %2293 = vmatprep.subr.mxu1 %v3953_v57  ;;  %v3795_v62 = vld [vmem:[%s3897_s5] ss:$0 sm:$0xff] }
 0x5e3   :  { %v1348_v0 = vpop.f32.mrf.mxu0  ;;  %v1419_v1 = vpop.f32.mrf.mxu1 }
 0x5e4   :  { %v1423_v20 = vadd.f32 %v1348_v0, %v3987_v6  ;;  %v1437_v0 = vadd.f32 %v3795_v62, %v1419_v1 }
 0x5e5   :  { %v2257_v21 = vpop.f32.mrf.mxu1  ;;  %v1350_v8 = vpop.f32.mrf.mxu0 }
 0x5e6   :  { %v1835_v2 = vmul.f32 -1.442695, %v1423_v20  ;;  %v1430_v10 = vadd.f32 %v1350_v8, %v3988_v9  ;;  %v3989_v21 = vld [vmem:[#allocation26_spill] sm:$0xff] }
 0x5e8   :  { %2383 = vpow2.f32 %v1835_v2  ;;  %v1836_v12 = vmul.f32 -1.442695, %v1430_v10 }
 0x5ea   :  { %2385 = vpow2.f32 %v1836_v12 }
 0x5f5   :  { %v2384_v14 = vpop.eup %2383 }
 0x5f6   :  { %v1427_v15 = vadd.f32 1.0, %v2384_v14 }
 0x5f7   :  { %v2386_v16 = vpop.eup %2385 }
 0x5f8   :  { %2387 = vrcp.f32 %v1427_v15  ;;  %v1434_v17 = vadd.f32 1.0, %v2386_v16  ;;  %v1449_v15 = vpop.permute.xlu1 %1448 }
 0x5f9   :  { %vm1450_vm14 = vcmp.eq.s32.totalorder %v1449_v15, 1 }
 0x5fa   :  { %2389 = vrcp.f32 %v1434_v17 }
 0x605   :  { %v2388_v6 = vpop.eup %2387 }
 0x606   :  { %v1438_v20 = vmul.f32 %v2388_v6, %v1437_v0  ;;  %v1803_v6 = vpop.permute.xlu1 %1802 }
 0x607   :  { %v2390_v8 = vpop.eup %2389  ;;  %vm1804_vm0 = vcmp.eq.s32.totalorder %v1803_v6, 1 }
 0x608   :  { %v1439_v2 = vadd.f32 %v1438_v20, %v3989_v21  ;;  %v1441_v9 = vsub.f32 1.0, %v2390_v8  ;;  %v1443_v14 = vmul.f32 %v2390_v8, %v3716_v19 }
 0x60a   :  { %2391 = vtanh.f32 %v1439_v2 }
 0x617   :  { %v2392_v10 = vpop.eup %2391 }
 0x618   :  { %v1442_v12 = vmul.f32 %v2392_v10, %v1441_v9 }
 0x61a   :  { %v1444_v16 = vadd.f32 %v1443_v14, %v1442_v12 }
 0x61c   :  { %v1451_v52 = vsel %vm1450_vm14, %v1444_v16, 0.0  ;;  %v3801_v22 = vsel %vm1450_vm14, %v1444_v16, %v3716_v19 }
 0x61d   :  { %1837 = vst [vmem:[%s3898_s6 + $0x28] sm:$0xff] %v1451_v52  ;;  %1524 = vmatmul.mubr.f32.vlgmr.msra.gmra.mxu0 %v3801_v22  ;;  %2291 = vmatmul.mubr.f32.vlgmr.msra.gmra.mxu1 %v3801_v22 }
 0x61e   :  { %1637 = vmatpush1.msra.mxu0 %v3331_v51  ;;  %2294 = vmatpush3.msra.mxu1 %v3547_v63  ;;  %v3990_v51 = vld [vmem:[#allocation10_spill] sm:$0xff] }
 0x61f   :  { %1638 = vmatprep.subr.mxu0 %v3338_v46  ;;  %2295 = vmatprep.subr.mxu1 %v3953_v57  ;;  %v3991_v46 = vld [vmem:[#allocation11_spill] sm:$0xff] }
 0x620   :  { %1639 = vmatpush1.msra.mxu0 %v3345_v7  ;;  %2296 = vmatpush3.msra.mxu1 %v3556_v28 }
 0x621   :  { %1640 = vmatprep.subr.mxu0 %v3352_v23  ;;  %2297 = vmatprep.subr.mxu1 %v3953_v57 }
 0x622   :  { %1641 = vmatpush1.msra.mxu0 %v3359_v61  ;;  %2298 = vmatpush3.msra.mxu1 %v3565_v4  ;;  %v3992_v61 = vld [vmem:[#allocation20_spill] sm:$0xff] }
 0x623   :  { %1642 = vmatprep.subr.mxu0 %v3366_v30  ;;  %2299 = vmatprep.subr.mxu1 %v3953_v57 }
 0x624   :  { %1643 = vmatpush1.msra.mxu0 %v3373_v42  ;;  %2300 = vmatpush3.msra.mxu1 %v3574_v3 }
 0x625   :  { %1644 = vmatprep.subr.mxu0 %v3380_v31  ;;  %2301 = vmatprep.subr.mxu1 %v3953_v57 }
 0x626   :  { %1645 = vmatpush1.msra.mxu0 %v3387_v5  ;;  %2302 = vmatpush3.msra.mxu1 %v3583_v55  ;;  %v3995_v55 = vld [vmem:[#allocation22_spill] sm:$0xff] }
 0x627   :  { %1646 = vmatprep.subr.mxu0 %v3394_v32  ;;  %2303 = vmatprep.subr.mxu1 %v3953_v57  ;;  %v3993_v32 = vld [vmem:[#allocation21_spill] sm:$0xff] }
 0x628   :  { %1647 = vmatpush1.msra.mxu0 %v3401_v13  ;;  %2304 = vmatpush3.msra.mxu1 %v3592_v33 }
 0x629   :  { %1648 = vmatprep.subr.mxu0 %v3408_v34  ;;  %2305 = vmatprep.subr.mxu1 %v3953_v57 }
 0x62a   :  { %1649 = vmatpush1.msra.mxu0 %v3415_v26  ;;  %2306 = vmatpush3.msra.mxu1 %v3601_v25 }
 0x62b   :  { %1650 = vmatprep.subr.mxu0 %v3422_v35  ;;  %2307 = vmatprep.subr.mxu1 %v3953_v57 }
 0x62c   :  { %1651 = vmatpush1.msra.mxu0 %v3429_v29  ;;  %2308 = vmatpush3.msra.mxu1 %v3610_v45 }
 0x62d   :  { %1652 = vmatprep.subr.mxu0 %v3436_v37  ;;  %2309 = vmatprep.subr.mxu1 %v3953_v57 }
 0x62e   :  { %1653 = vmatpush1.msra.mxu0 %v3443_v36  ;;  %2310 = vmatpush3.msra.mxu1 %v3619_v49 }
 0x62f   :  { %1654 = vmatprep.subr.mxu0 %v3450_v38  ;;  %2311 = vmatprep.subr.mxu1 %v3953_v57 }
 0x630   :  { %1655 = vmatpush1.msra.mxu0 %v3457_v24  ;;  %2312 = vmatpush3.msra.mxu1 %v3628_v11  ;;  %v3994_v24 = vld [vmem:[#allocation29_spill] sm:$0xff]  ;;  %v3996_v11 = vld [vmem:[#allocation23_spill] sm:$0xff] }
 0x631   :  { %1656 = vmatprep.subr.mxu0 %v3464_v40  ;;  %2313 = vmatprep.subr.mxu1 %v3953_v57 }
 0x632   :  { %1657 = vmatpush1.msra.mxu0 %v3471_v18  ;;  %2314 = vmatpush3.msra.mxu1 %v3637_v47 }
 0x633   :  { %1658 = vmatprep.subr.mxu0 %v3478_v41  ;;  %2315 = vmatprep.subr.mxu1 %v3953_v57 }
 0x634   :  { %1659 = vmatpush1.msra.mxu0 %v3485_v39  ;;  %2316 = vmatpush3.msra.mxu1 %v3646_v48 }
 0x635   :  { %1660 = vmatprep.subr.mxu0 %v3492_v43  ;;  %2317 = vmatprep.subr.mxu1 %v3953_v57  ;;  %v1626_v43 = vpop.permute.xlu0 %1625 }
 0x636   :  { %1661 = vmatpush1.msra.mxu0 %v3499_v54  ;;  %2318 = vmatpush3.msra.mxu1 %v3655_v58  ;;  %vm1627_vm15 = vcmp.eq.s32.totalorder %v1626_v43, 1 }
 0x637   :  { %1662 = vmatprep.subr.mxu0 %v3506_v44  ;;  %2319 = vmatprep.subr.mxu1 %v3953_v57 }
 0x638   :  { %1663 = vmatpush1.msra.mxu0 %v3513_v56  ;;  %2320 = vmatpush3.msra.mxu1 %v3664_v50 }
 0x639   :  { %1664 = vmatprep.subr.mxu0 %v3670_v59  ;;  %2321 = vmatprep.subr.mxu1 %v3953_v57 }
 0x63a   :  { %1665 = vmatpush1.msra.mxu0 %v3677_v60  ;;  %2322 = vmatpush3.msra.mxu1 %v3982_v27 }
 0x63b   :  { %1666 = vmatprep.subr.mxu0 %v3983_v53  ;;  %2323 = vmatprep.subr.mxu1 %v3953_v57 }
 0x63c   :  { %1667 = vmatpush1.msra.mxu0 %v3990_v51  ;;  %1700 = vmatprep.mubr.f32.mxu0 %v3953_v57 }
 0x63d   :  { %2324 = vmatpush3.msra.mxu1 %v3991_v46  ;;  %2325 = vmatprep.mubr.msk.f32.mxu1 %vm2464_vm4, %v3953_v57 }
 0x6dd   :  { %v1525_v7 = vpop.f32.mrf.mxu0  ;;  %v1596_v23 = vpop.f32.mrf.mxu1 }
 0x6de   :  { %v1600_v30 = vadd.f32 %v1525_v7, %v3992_v61  ;;  %v1614_v36 = vadd.f32 %v3795_v62, %v1596_v23 }
 0x6df   :  { %v2292_v42 = vpop.f32.mrf.mxu1  ;;  %v1527_v5 = vpop.f32.mrf.mxu0 }
 0x6e0   :  { %v1838_v31 = vmul.f32 -1.442695, %v1600_v30  ;;  %v1607_v13 = vadd.f32 %v1527_v5, %v3993_v32 }
 0x6e2   :  { %2393 = vpow2.f32 %v1838_v31  ;;  %v1839_v34 = vmul.f32 -1.442695, %v1607_v13 }
 0x6e4   :  { %2395 = vpow2.f32 %v1839_v34 }
 0x6ef   :  { %v2394_v26 = vpop.eup %2393 }
 0x6f0   :  { %v1604_v35 = vadd.f32 1.0, %v2394_v26 }
 0x6f1   :  { %v2396_v29 = vpop.eup %2395 }
 0x6f2   :  { %2397 = vrcp.f32 %v1604_v35  ;;  %v1611_v37 = vadd.f32 1.0, %v2396_v29 }
 0x6f4   :  { %2399 = vrcp.f32 %v1611_v37 }
 0x6ff   :  { %v2398_v57 = vpop.eup %2397 }
 0x700   :  { %v1615_v38 = vmul.f32 %v2398_v57, %v1614_v36 }
 0x701   :  { %v2400_v18 = vpop.eup %2399 }
 0x702   :  { %v1616_v40 = vadd.f32 %v1615_v38, %v3994_v24  ;;  %v1618_v41 = vsub.f32 1.0, %v2400_v18  ;;  %v1620_v44 = vmul.f32 %v2400_v18, %v3801_v22 }
 0x704   :  { %2401 = vtanh.f32 %v1616_v40 }
 0x711   :  { %v2402_v39 = vpop.eup %2401 }
 0x712   :  { %v1619_v54 = vmul.f32 %v2402_v39, %v1618_v41 }
 0x714   :  { %v1621_v56 = vadd.f32 %v1620_v44, %v1619_v54 }
 0x716   :  { %v1628_v63 = vsel %vm1627_vm15, %v1621_v56, 0.0  ;;  %v1631_v28 = vsel %vm1627_vm15, %v1621_v56, %v3801_v22  ;;  %v3997_v22 = vld [vmem:[#allocation28_spill] sm:$0xff] }
 0x717   :  { %1840 = vst [vmem:[%s3898_s6 + $0x30] sm:$0xff] %v1628_v63  ;;  %1701 = vmatmul.mubr.f32.vlgmr.msra.gmra.mxu0 %v1631_v28  ;;  %2326 = vmatmul.mubr.f32.vlgmr.msra.gmra.mxu1 %v1631_v28 }
 0x7d7   :  { %v1702_v4 = vpop.f32.mrf.mxu0  ;;  %v1773_v3 = vpop.f32.mrf.mxu1 }
 0x7d8   :  { %v1777_v33 = vadd.f32 %v1702_v4, %v3995_v55  ;;  %v1791_v19 = vadd.f32 %v3795_v62, %v1773_v3 }
 0x7d9   :  { %v2327_v25 = vpop.f32.mrf.mxu1  ;;  %v1704_v49 = vpop.f32.mrf.mxu0 }
 0x7da   :  { %v1841_v45 = vmul.f32 -1.442695, %v1777_v33  ;;  %v1784_v47 = vadd.f32 %v1704_v49, %v3996_v11 }
 0x7dc   :  { %2403 = vpow2.f32 %v1841_v45  ;;  %v1842_v48 = vmul.f32 -1.442695, %v1784_v47 }
 0x7de   :  { %2405 = vpow2.f32 %v1842_v48 }
 0x7e9   :  { %v2404_v58 = vpop.eup %2403 }
 0x7ea   :  { %v1781_v50 = vadd.f32 1.0, %v2404_v58 }
 0x7eb   :  { %v2406_v59 = vpop.eup %2405 }
 0x7ec   :  { %2407 = vrcp.f32 %v1781_v50  ;;  %v1788_v60 = vadd.f32 1.0, %v2406_v59 }
 0x7ee   :  { %2409 = vrcp.f32 %v1788_v60 }
 0x7f9   :  { %v2408_v27 = vpop.eup %2407 }
 0x7fa   :  { %v1792_v53 = vmul.f32 %v2408_v27, %v1791_v19 }
 0x7fb   :  { %v2410_v1 = vpop.eup %2409 }
 0x7fc   :  { %v1793_v52 = vadd.f32 %v1792_v53, %v3997_v22  ;;  %v1795_v17 = vsub.f32 1.0, %v2410_v1  ;;  %v1797_v21 = vmul.f32 %v2410_v1, %v1631_v28 }
 0x7fe   :  { %2411 = vtanh.f32 %v1793_v52 }
 0x80b   :  { %v2412_v0 = vpop.eup %2411 }
 0x80c   :  { %v1796_v20 = vmul.f32 %v2412_v0, %v1795_v17 }
 0x80e   :  { %v1798_v2 = vadd.f32 %v1797_v21, %v1796_v20 }
 0x810   :  { %v1805_v8 = vsel %vm1804_vm0, %v1798_v2, 0.0  ;;  %v1808_v9 = vsel %vm1804_vm0, %v1798_v2, %v1631_v28 }
 0x811   :  { %1843 = vst [vmem:[%s3898_s6 + $0x38] sm:$0xff] %v1805_v8  ;;  %1809 = vst [vmem:[%s3899_s7] sm:$0xff] %v1808_v9 }

</bundles_post_ra>
